<compile_context>
chip_gen: v5e
topology: v5e:2x2
jax: 0.10.0
libtpu: 0.0.40
codegen_flags: <defaults>
</compile_context>

<pallas_src>
import jax
import jax.numpy as jnp
from jax import lax
from jax.experimental import pallas as pl
from jax.experimental.pallas import tpu as pltpu


def _round_up(v, m):
    return (v + m - 1) // m * m


def _cdiv(a, b):
    return -(-a // b)


def _phase_plan(in_size, k, s, p, q_count):
    """Per-output-phase tap plan for one spatial axis.

    For output index o = s*q + ph only kernel taps k_f == (k-1-p-ph) mod s of
    the *flipped* kernel contribute, and they read the dense input at
    x[q + off] for a static per-tap offset `off` (into the padded dense input).

    Returns: (taps, pad_lo, pad_hi, halo) where
      taps[ph]  = list of (k_flip_index, offset_into_padded_x)
      pad_lo/hi = zero padding of the dense input along this axis
      halo      = max offset (extra rows a row-tile must carry).
    """
    pad_conv = k - 1 - p
    raw = []
    for ph in range(s):
        r = (pad_conv - ph) % s
        lst = []
        kk = r
        while kk < k:
            t = (kk - r) // s
            d = (ph + r - pad_conv) // s + t     # exact integer division
            lst.append((kk, d))
            kk += s
        raw.append(lst)
    all_d = [d for lst in raw for (_, d) in lst]
    dmin = min(all_d) if all_d else 0
    dmax = max(all_d) if all_d else 0
    pad_lo = max(0, -dmin)
    halo = dmax + pad_lo
    taps = [[(kk, d + pad_lo) for (kk, d) in lst] for lst in raw]
    pad_hi = max(0, q_count + halo - pad_lo - in_size)
    return taps, pad_lo, pad_hi, halo


def _make_kernel(stride, taps_h, taps_w, tile_hq, wq, cin_p, cout_p):
    """Fused phase-decomposed transposed-conv + (+shift) + ReLU kernel."""

    def kernel(x_ref, w_ref, shift_ref, o_ref, acc_ref):
        # x_ref:     (1, 1, tile_hq + halo_h, Wx, cin_p)   dense (haloed) tile
        # w_ref:     (kH, kW, cin_p, cout_p)   flipped weight, BN scale folded
        # shift_ref: (1, cout_p)               fused BN/bias shift (f32)
        # o_ref:     (1, s*s, tile_hq*wq, cout_p)  phase-separated output
        # acc_ref:   VMEM (tile_hq*wq, cout_p) f32 accumulator
        shift = shift_ref[...]
        for ph in range(stride):
            for pw in range(stride):
                taps = [(kh, kw, oh, ow)
                        for (kh, oh) in taps_h[ph]
                        for (kw, ow) in taps_w[pw]]
                if not taps:                      # s > k: only shift survives
                    acc_ref[...] = jnp.zeros_like(acc_ref)
                for i, (kh, kw, oh, ow) in enumerate(taps):
                    patch = x_ref[0, 0, oh:oh + tile_hq, ow:ow + wq, :]
                    patch = patch.reshape(tile_hq * wq, cin_p)
                    contrib = jnp.dot(patch, w_ref[kh, kw],
                                      preferred_element_type=jnp.float32)
                    if i == 0:
                        acc_ref[...] = contrib
                    else:
                        acc_ref[...] += contrib
                o_ref[0, ph * stride + pw] = jnp.maximum(
                    acc_ref[...] + shift, 0.0).astype(o_ref.dtype)

    return kernel


def conv2d_transpose_bn_relu(x_nchw, weight, bias, gamma, beta, running_mean,
                             running_var, *, stride, padding, output_padding,
                             eps=1e-5, tile_hq=8, compute_dtype=None):
    """x_nchw: (N, Cin, H, W); weight: (Cin, Cout, kH, kW) as in ConvTranspose2d."""
    cin, cout, kH, kW = weight.shape
    N, C, H, W = x_nchw.shape
    assert C == cin
    s = int(stride)
    p = int(padding)
    op = int(output_padding)
    assert s >= 1 and p >= 0 and 0 <= op < max(s, 1)

    Hout = (H - 1) * s - 2 * p + kH + op
    Wout = (W - 1) * s - 2 * p + kW + op
    Hq = _cdiv(Hout, s)       # per-phase output rows (computed uniformly, cropped later)
    Wq = _cdiv(Wout, s)

    # --- spatial row tiling (grid axis 1); tiles must stay sublane-aligned ---
    tile_hq = max(1, min(int(tile_hq), Hq))
    if tile_hq < Hq and tile_hq % 8:
        tile_hq = min(Hq, _round_up(tile_hq, 8))
    ntiles = _cdiv(Hq, tile_hq)
    Hq_pad = ntiles * tile_hq

    taps_h, pad_lo_h, pad_hi_h, halo_h = _phase_plan(H, kH, s, p, Hq_pad)
    taps_w, pad_lo_w, pad_hi_w, halo_w = _phase_plan(W, kW, s, p, Wq)

    cin_p = _round_up(cin, 8)        # sublane alignment of the contraction dim
    cout_p = _round_up(cout, 128)    # lane-dense output stores

    # ---- glue (plain JAX): layout, padding, pre-haloed row tiles, weight prep ----
    x = jnp.transpose(x_nchw, (0, 2, 3, 1))                       # NCHW -> NHWC
    xpad = jnp.pad(x, ((0, 0), (pad_lo_h, pad_hi_h),
                       (pad_lo_w, pad_hi_w), (0, cin_p - cin)))
    Wx = xpad.shape[2]
    # (N, ntiles, tile_hq + halo_h, Wx, cin_p): each row tile carries its halo.
    xt = jnp.stack([xpad[:, r * tile_hq: r * tile_hq + tile_hq + halo_h]
                    for r in range(ntiles)], axis=1)

    inv_std = 1.0 / jnp.sqrt(running_var.astype(jnp.float32) + eps)
    scale = gamma.astype(jnp.float32) * inv_std                           # (cout,)
    shift = (beta.astype(jnp.float32) +
             (bias.astype(jnp.float32) - running_mean.astype(jnp.float32)) * scale)
    # (Cin, Cout, kH, kW) --flip HW--> (kH, kW, Cin, Cout), fold BN scale in.
    wflip = jnp.transpose(weight[:, :, ::-1, ::-1], (2, 3, 0, 1))
    wscaled = (wflip * scale[None, None, None, :]).astype(x.dtype)
    wfull = jnp.pad(wscaled, ((0, 0), (0, 0),
                              (0, cin_p - cin), (0, cout_p - cout)))
    shift_p = jnp.pad(shift, (0, cout_p - cout)).reshape(1, cout_p)

    if compute_dtype is not None:                  # e.g. bf16 on v6e/v7x
        xt = xt.astype(compute_dtype)
        wfull = wfull.astype(compute_dtype)

    P = s * s
    kernel = _make_kernel(s, taps_h, taps_w, tile_hq, Wq, cin_p, cout_p)

    # Explicit scoped-VMEM budget (v7x: 64 MiB physical per TensorCore).
    isz = xt.dtype.itemsize
    in_blk = (tile_hq + halo_h) * Wx * cin_p * isz
    out_blk = P * tile_hq * Wq * cout_p * x.dtype.itemsize
    w_bytes = kH * kW * cin_p * cout_p * wfull.dtype.itemsize
    acc_bytes = tile_hq * Wq * cout_p * 4
    vmem_est = 2 * (in_blk + out_blk) + 2 * w_bytes + acc_bytes + (1 << 20)
    vmem_limit = int(min(max(vmem_est, 16 << 20), 64 << 20))

    out_k = pl.pallas_call(
        kernel,
        out_shape=jax.ShapeDtypeStruct((N, P, Hq_pad * Wq, cout_p), x.dtype),
        grid_spec=pltpu.PrefetchScalarGridSpec(
            num_scalar_prefetch=0,
            grid=(N, ntiles),
            in_specs=[
                pl.BlockSpec((1, 1, tile_hq + halo_h, Wx, cin_p),
                             lambda n, r: (n, r, 0, 0, 0)),
                pl.BlockSpec((kH, kW, cin_p, cout_p),
                             lambda n, r: (0, 0, 0, 0)),
                pl.BlockSpec((1, cout_p), lambda n, r: (0, 0)),
            ],
            out_specs=pl.BlockSpec((1, P, tile_hq * Wq, cout_p),
                                   lambda n, r: (n, 0, r, 0)),
            scratch_shapes=[pltpu.VMEM((tile_hq * Wq, cout_p), jnp.float32)],
        ),
        compiler_params=pltpu.CompilerParams(
            dimension_semantics=("parallel", "parallel"),
            vmem_limit_bytes=vmem_limit),
    )(xt, wfull, shift_p)

    # ---- interleave phases back and go NHWC(phase) -> NCHW in one transpose ----
    y = out_k[..., :cout].reshape(N, s, s, Hq_pad, Wq, cout)   # (N,ph,pw,qh,qw,c)
    y = jnp.transpose(y, (0, 5, 3, 1, 4, 2))                   # (N,c,qh,ph,qw,pw)
    y = y.reshape(N, cout, Hq_pad * s, Wq * s)[:, :, :Hout, :Wout]
    return y


def _reference(x_nchw, weight, bias, gamma, beta, mean, var, *, stride,
               padding, output_padding, eps=1e-5):
    """Pure-JAX reference (same math as PyTorch ConvTranspose2d + BN(eval) + ReLU)."""
    cin, cout, kH, kW = weight.shape
    x = jnp.transpose(x_nchw, (0, 2, 3, 1))
    wflip = jnp.transpose(weight[:, :, ::-1, ::-1], (2, 3, 0, 1))  # HWIO
    out = lax.conv_general_dilated(
        x, wflip, window_strides=(1, 1),
        padding=((kH - 1 - padding, kH - 1 - padding + output_padding),
                 (kW - 1 - padding, kW - 1 - padding + output_padding)),
        lhs_dilation=(stride, stride),
        dimension_numbers=('NHWC', 'HWIO', 'NHWC'))
    out = out + bias
    out = (out - mean) / jnp.sqrt(var + eps) * gamma + beta
    out = jnp.maximum(out, 0.0)
    return jnp.transpose(out, (0, 3, 1, 2))


if __name__ == "__main__":
    key = jax.random.PRNGKey(0)
    kx, kw, kb, kg, kbe, km, kv = jax.random.split(key, 7)

    # batch=2, cin=4, cout=8, spatial 16x16, k=4, stride=2, pad=1 -> out 32x32.
    N, cin, H, W = 2, 4, 16, 16
    cout, ksz, stride, padding, output_padding = 8, 4, 2, 1, 0

    x = jax.random.normal(kx, (N, cin, H, W), jnp.float32)
    weight = jax.random.normal(kw, (cin, cout, ksz, ksz), jnp.float32) * 0.1
    bias = jax.random.normal(kb, (cout,), jnp.float32) * 0.1
    gamma = jax.random.uniform(kg, (cout,), jnp.float32, 0.5, 1.5)
    beta = jax.random.normal(kbe, (cout,), jnp.float32) * 0.1
    running_mean = jax.random.normal(km, (cout,), jnp.float32) * 0.1
    running_var = jax.random.uniform(kv, (cout,), jnp.float32, 0.5, 1.5)

    out = conv2d_transpose_bn_relu(
        x, weight, bias, gamma, beta, running_mean, running_var,
        stride=stride, padding=padding, output_padding=output_padding,
        tile_hq=8)
    out = jax.block_until_ready(out)

    Hout = (H - 1) * stride - 2 * padding + ksz + output_padding
    assert out.shape == (N, cout, Hout, Hout), out.shape

    ref = _reference(
        x, weight, bias, gamma, beta, running_mean, running_var,
        stride=stride, padding=padding, output_padding=output_padding)
    assert jnp.allclose(out, ref, atol=1e-4, rtol=1e-4), \
        float(jnp.max(jnp.abs(out - ref)))

    print("KERNEL_OK")
</pallas_src>

<mosaic_0001>
module attributes {stable_mosaic.version = 11 : i64} {
  func.func @kernel(%arg0: i32, %arg1: i32, %arg2: memref<1x1x10x18x8xf32, #tpu.memory_space<vmem>>, %arg3: memref<4x4x8x128xf32, #tpu.memory_space<vmem>>, %arg4: memref<1x128xf32, #tpu.memory_space<vmem>>, %arg5: memref<1x4x128x128xf32, #tpu.memory_space<vmem>>, %arg6: memref<128x128xf32, #tpu.memory_space<vmem>>) attributes {dimension_semantics = [#tpu.dimension_semantics<parallel>, #tpu.dimension_semantics<parallel>], iteration_bounds = array<i64: 2, 2>, scalar_prefetch = 0 : i64, scratch_operands = 1 : i64, tpu.core_type = #tpu.core_type<tc>, window_params = [{transform_indices = @transform_0, window_bounds = array<i64: 1, 1, 10, 18, 8>}, {pipeline_mode = #tpu.pipeline_mode<synchronous>, transform_indices = @transform_1, window_bounds = array<i64: 4, 4, 8, 128>}, {pipeline_mode = #tpu.pipeline_mode<synchronous>, transform_indices = @transform_2, window_bounds = array<i64: 1, 128>}, {transform_indices = @transform_3, window_bounds = array<i64: 1, 4, 128, 128>}]} {
    %c0 = arith.constant 0 : index
    %c0_0 = arith.constant 0 : index
    %0 = vector.load %arg4[%c0, %c0_0] : memref<1x128xf32, #tpu.memory_space<vmem>>, vector<1x128xf32>
    %c0_1 = arith.constant 0 : index
    %c0_2 = arith.constant 0 : index
    %c0_3 = arith.constant 0 : index
    %c0_4 = arith.constant 0 : index
    %c0_5 = arith.constant 0 : index
    %1 = vector.load %arg2[%c0_1, %c0_2, %c0_3, %c0_4, %c0_5] : memref<1x1x10x18x8xf32, #tpu.memory_space<vmem>>, vector<1x1x8x16x8xf32>
    %2 = vector.shape_cast %1 : vector<1x1x8x16x8xf32> to vector<8x16x8xf32>
    %3 = vector.shape_cast %2 : vector<8x16x8xf32> to vector<128x8xf32>
    %c0_6 = arith.constant 0 : index
    %c0_7 = arith.constant 0 : index
    %c0_8 = arith.constant 0 : index
    %c0_9 = arith.constant 0 : index
    %4 = vector.load %arg3[%c0_6, %c0_7, %c0_8, %c0_9] : memref<4x4x8x128xf32, #tpu.memory_space<vmem>>, vector<1x1x8x128xf32>
    %5 = vector.shape_cast %4 : vector<1x1x8x128xf32> to vector<8x128xf32>
    %cst = arith.constant dense<0.000000e+00> : vector<128x128xf32>
    %6 = tpu.matmul %3, %5, %cst {dimension_numbers = #tpu.dot_dimension_numbers<[1], [0], [0], [1], [0, 0, 1, 1], [], []>} : vector<128x8xf32>, vector<8x128xf32>, vector<128x128xf32> -> vector<128x128xf32>
    %c0_10 = arith.constant 0 : index
    %c0_11 = arith.constant 0 : index
    %7 = vector.load %arg6[%c0_10, %c0_11] : memref<128x128xf32, #tpu.memory_space<vmem>>, vector<128x128xf32>
    tpu.vector_store %arg6[%c0_10, %c0_11], %6 {strides = array<i32>} : memref<128x128xf32, #tpu.memory_space<vmem>>, vector<128x128xf32>,
    %c0_12 = arith.constant 0 : index
    %c0_13 = arith.constant 0 : index
    %c0_14 = arith.constant 0 : index
    %c1 = arith.constant 1 : index
    %c0_15 = arith.constant 0 : index
    %8 = vector.load %arg2[%c0_12, %c0_13, %c0_14, %c1, %c0_15] : memref<1x1x10x18x8xf32, #tpu.memory_space<vmem>>, vector<1x1x8x16x8xf32>
    %9 = vector.shape_cast %8 : vector<1x1x8x16x8xf32> to vector<8x16x8xf32>
    %10 = vector.shape_cast %9 : vector<8x16x8xf32> to vector<128x8xf32>
    %c0_16 = arith.constant 0 : index
    %c2 = arith.constant 2 : index
    %c0_17 = arith.constant 0 : index
    %c0_18 = arith.constant 0 : index
    %11 = vector.load %arg3[%c0_16, %c2, %c0_17, %c0_18] : memref<4x4x8x128xf32, #tpu.memory_space<vmem>>, vector<1x1x8x128xf32>
    %12 = vector.shape_cast %11 : vector<1x1x8x128xf32> to vector<8x128xf32>
    %cst_19 = arith.constant dense<0.000000e+00> : vector<128x128xf32>
    %13 = tpu.matmul %10, %12, %cst_19 {dimension_numbers = #tpu.dot_dimension_numbers<[1], [0], [0], [1], [0, 0, 1, 1], [], []>} : vector<128x8xf32>, vector<8x128xf32>, vector<128x128xf32> -> vector<128x128xf32>
    %c0_20 = arith.constant 0 : index
    %c0_21 = arith.constant 0 : index
    %14 = vector.load %arg6[%c0_20, %c0_21] : memref<128x128xf32, #tpu.memory_space<vmem>>, vector<128x128xf32>
    %15 = arith.addf %14, %13 : vector<128x128xf32>
    %c0_22 = arith.constant 0 : index
    %c0_23 = arith.constant 0 : index
    %16 = vector.load %arg6[%c0_22, %c0_23] : memref<128x128xf32, #tpu.memory_space<vmem>>, vector<128x128xf32>
    tpu.vector_store %arg6[%c0_22, %c0_23], %15 {strides = array<i32>} : memref<128x128xf32, #tpu.memory_space<vmem>>, vector<128x128xf32>,
    %c0_24 = arith.constant 0 : index
    %c0_25 = arith.constant 0 : index
    %c1_26 = arith.constant 1 : index
    %c0_27 = arith.constant 0 : index
    %c0_28 = arith.constant 0 : index
    %17 = vector.load %arg2[%c0_24, %c0_25, %c1_26, %c0_27, %c0_28] : memref<1x1x10x18x8xf32, #tpu.memory_space<vmem>>, vector<1x1x8x16x8xf32>
    %18 = vector.shape_cast %17 : vector<1x1x8x16x8xf32> to vector<8x16x8xf32>
    %19 = vector.shape_cast %18 : vector<8x16x8xf32> to vector<128x8xf32>
    %c2_29 = arith.constant 2 : index
    %c0_30 = arith.constant 0 : index
    %c0_31 = arith.constant 0 : index
    %c0_32 = arith.constant 0 : index
    %20 = vector.load %arg3[%c2_29, %c0_30, %c0_31, %c0_32] : memref<4x4x8x128xf32, #tpu.memory_space<vmem>>, vector<1x1x8x128xf32>
    %21 = vector.shape_cast %20 : vector<1x1x8x128xf32> to vector<8x128xf32>
    %cst_33 = arith.constant dense<0.000000e+00> : vector<128x128xf32>
    %22 = tpu.matmul %19, %21, %cst_33 {dimension_numbers = #tpu.dot_dimension_numbers<[1], [0], [0], [1], [0, 0, 1, 1], [], []>} : vector<128x8xf32>, vector<8x128xf32>, vector<128x128xf32> -> vector<128x128xf32>
    %c0_34 = arith.constant 0 : index
    %c0_35 = arith.constant 0 : index
    %23 = vector.load %arg6[%c0_34, %c0_35] : memref<128x128xf32, #tpu.memory_space<vmem>>, vector<128x128xf32>
    %24 = arith.addf %23, %22 : vector<128x128xf32>
    %c0_36 = arith.constant 0 : index
    %c0_37 = arith.constant 0 : index
    %25 = vector.load %arg6[%c0_36, %c0_37] : memref<128x128xf32, #tpu.memory_space<vmem>>, vector<128x128xf32>
    tpu.vector_store %arg6[%c0_36, %c0_37], %24 {strides = array<i32>} : memref<128x128xf32, #tpu.memory_space<vmem>>, vector<128x128xf32>,
    %c0_38 = arith.constant 0 : index
    %c0_39 = arith.constant 0 : index
    %c1_40 = arith.constant 1 : index
    %c1_41 = arith.constant 1 : index
    %c0_42 = arith.constant 0 : index
    %26 = vector.load %arg2[%c0_38, %c0_39, %c1_40, %c1_41, %c0_42] : memref<1x1x10x18x8xf32, #tpu.memory_space<vmem>>, vector<1x1x8x16x8xf32>
    %27 = vector.shape_cast %26 : vector<1x1x8x16x8xf32> to vector<8x16x8xf32>
    %28 = vector.shape_cast %27 : vector<8x16x8xf32> to vector<128x8xf32>
    %c2_43 = arith.constant 2 : index
    %c2_44 = arith.constant 2 : index
    %c0_45 = arith.constant 0 : index
    %c0_46 = arith.constant 0 : index
    %29 = vector.load %arg3[%c2_43, %c2_44, %c0_45, %c0_46] : memref<4x4x8x128xf32, #tpu.memory_space<vmem>>, vector<1x1x8x128xf32>
    %30 = vector.shape_cast %29 : vector<1x1x8x128xf32> to vector<8x128xf32>
    %cst_47 = arith.constant dense<0.000000e+00> : vector<128x128xf32>
    %31 = tpu.matmul %28, %30, %cst_47 {dimension_numbers = #tpu.dot_dimension_numbers<[1], [0], [0], [1], [0, 0, 1, 1], [], []>} : vector<128x8xf32>, vector<8x128xf32>, vector<128x128xf32> -> vector<128x128xf32>
    %c0_48 = arith.constant 0 : index
    %c0_49 = arith.constant 0 : index
    %32 = vector.load %arg6[%c0_48, %c0_49] : memref<128x128xf32, #tpu.memory_space<vmem>>, vector<128x128xf32>
    %33 = arith.addf %32, %31 : vector<128x128xf32>
    %c0_50 = arith.constant 0 : index
    %c0_51 = arith.constant 0 : index
    %34 = vector.load %arg6[%c0_50, %c0_51] : memref<128x128xf32, #tpu.memory_space<vmem>>, vector<128x128xf32>
    tpu.vector_store %arg6[%c0_50, %c0_51], %33 {strides = array<i32>} : memref<128x128xf32, #tpu.memory_space<vmem>>, vector<128x128xf32>,
    %c0_52 = arith.constant 0 : index
    %c0_53 = arith.constant 0 : index
    %35 = vector.load %arg6[%c0_52, %c0_53] : memref<128x128xf32, #tpu.memory_space<vmem>>, vector<128x128xf32>
    %36 = vector.broadcast %0 : vector<1x128xf32> to vector<128x128xf32>
    %37 = arith.addf %35, %36 : vector<128x128xf32>
    %cst_54 = arith.constant 0.000000e+00 : f32
    %38 = vector.broadcast %cst_54 : f32 to vector<128x128xf32>
    %39 = arith.maximumf %37, %38 : vector<128x128xf32>
    %c0_55 = arith.constant 0 : index
    %c0_56 = arith.constant 0 : index
    %c0_57 = arith.constant 0 : index
    %c0_58 = arith.constant 0 : index
    %40 = vector.load %arg5[%c0_55, %c0_56, %c0_57, %c0_58] : memref<1x4x128x128xf32, #tpu.memory_space<vmem>>, vector<1x1x128x128xf32>
    %41 = vector.shape_cast %40 : vector<1x1x128x128xf32> to vector<128x128xf32>
    %42 = vector.shape_cast %39 : vector<128x128xf32> to vector<1x1x128x128xf32>
    tpu.vector_store %arg5[%c0_55, %c0_56, %c0_57, %c0_58], %42 {strides = array<i32>} : memref<1x4x128x128xf32, #tpu.memory_space<vmem>>, vector<1x1x128x128xf32>,
    %c0_59 = arith.constant 0 : index
    %c0_60 = arith.constant 0 : index
    %c0_61 = arith.constant 0 : index
    %c1_62 = arith.constant 1 : index
    %c0_63 = arith.constant 0 : index
    %43 = vector.load %arg2[%c0_59, %c0_60, %c0_61, %c1_62, %c0_63] : memref<1x1x10x18x8xf32, #tpu.memory_space<vmem>>, vector<1x1x8x16x8xf32>
    %44 = vector.shape_cast %43 : vector<1x1x8x16x8xf32> to vector<8x16x8xf32>
    %45 = vector.shape_cast %44 : vector<8x16x8xf32> to vector<128x8xf32>
    %c0_64 = arith.constant 0 : index
    %c1_65 = arith.constant 1 : index
    %c0_66 = arith.constant 0 : index
    %c0_67 = arith.constant 0 : index
    %46 = vector.load %arg3[%c0_64, %c1_65, %c0_66, %c0_67] : memref<4x4x8x128xf32, #tpu.memory_space<vmem>>, vector<1x1x8x128xf32>
    %47 = vector.shape_cast %46 : vector<1x1x8x128xf32> to vector<8x128xf32>
    %cst_68 = arith.constant dense<0.000000e+00> : vector<128x128xf32>
    %48 = tpu.matmul %45, %47, %cst_68 {dimension_numbers = #tpu.dot_dimension_numbers<[1], [0], [0], [1], [0, 0, 1, 1], [], []>} : vector<128x8xf32>, vector<8x128xf32>, vector<128x128xf32> -> vector<128x128xf32>
    %c0_69 = arith.constant 0 : index
    %c0_70 = arith.constant 0 : index
    %49 = vector.load %arg6[%c0_69, %c0_70] : memref<128x128xf32, #tpu.memory_space<vmem>>, vector<128x128xf32>
    tpu.vector_store %arg6[%c0_69, %c0_70], %48 {strides = array<i32>} : memref<128x128xf32, #tpu.memory_space<vmem>>, vector<128x128xf32>,
    %c0_71 = arith.constant 0 : index
    %c0_72 = arith.constant 0 : index
    %c0_73 = arith.constant 0 : index
    %c2_74 = arith.constant 2 : index
    %c0_75 = arith.constant 0 : index
    %50 = vector.load %arg2[%c0_71, %c0_72, %c0_73, %c2_74, %c0_75] : memref<1x1x10x18x8xf32, #tpu.memory_space<vmem>>, vector<1x1x8x16x8xf32>
    %51 = vector.shape_cast %50 : vector<1x1x8x16x8xf32> to vector<8x16x8xf32>
    %52 = vector.shape_cast %51 : vector<8x16x8xf32> to vector<128x8xf32>
    %c0_76 = arith.constant 0 : index
    %c3 = arith.constant 3 : index
    %c0_77 = arith.constant 0 : index
    %c0_78 = arith.constant 0 : index
    %53 = vector.load %arg3[%c0_76, %c3, %c0_77, %c0_78] : memref<4x4x8x128xf32, #tpu.memory_space<vmem>>, vector<1x1x8x128xf32>
    %54 = vector.shape_cast %53 : vector<1x1x8x128xf32> to vector<8x128xf32>
    %cst_79 = arith.constant dense<0.000000e+00> : vector<128x128xf32>
    %55 = tpu.matmul %52, %54, %cst_79 {dimension_numbers = #tpu.dot_dimension_numbers<[1], [0], [0], [1], [0, 0, 1, 1], [], []>} : vector<128x8xf32>, vector<8x128xf32>, vector<128x128xf32> -> vector<128x128xf32>
    %c0_80 = arith.constant 0 : index
    %c0_81 = arith.constant 0 : index
    %56 = vector.load %arg6[%c0_80, %c0_81] : memref<128x128xf32, #tpu.memory_space<vmem>>, vector<128x128xf32>
    %57 = arith.addf %56, %55 : vector<128x128xf32>
    %c0_82 = arith.constant 0 : index
    %c0_83 = arith.constant 0 : index
    %58 = vector.load %arg6[%c0_82, %c0_83] : memref<128x128xf32, #tpu.memory_space<vmem>>, vector<128x128xf32>
    tpu.vector_store %arg6[%c0_82, %c0_83], %57 {strides = array<i32>} : memref<128x128xf32, #tpu.memory_space<vmem>>, vector<128x128xf32>,
    %c0_84 = arith.constant 0 : index
    %c0_85 = arith.constant 0 : index
    %c1_86 = arith.constant 1 : index
    %c1_87 = arith.constant 1 : index
    %c0_88 = arith.constant 0 : index
    %59 = vector.load %arg2[%c0_84, %c0_85, %c1_86, %c1_87, %c0_88] : memref<1x1x10x18x8xf32, #tpu.memory_space<vmem>>, vector<1x1x8x16x8xf32>
    %60 = vector.shape_cast %59 : vector<1x1x8x16x8xf32> to vector<8x16x8xf32>
    %61 = vector.shape_cast %60 : vector<8x16x8xf32> to vector<128x8xf32>
    %c2_89 = arith.constant 2 : index
    %c1_90 = arith.constant 1 : index
    %c0_91 = arith.constant 0 : index
    %c0_92 = arith.constant 0 : index
    %62 = vector.load %arg3[%c2_89, %c1_90, %c0_91, %c0_92] : memref<4x4x8x128xf32, #tpu.memory_space<vmem>>, vector<1x1x8x128xf32>
    %63 = vector.shape_cast %62 : vector<1x1x8x128xf32> to vector<8x128xf32>
    %cst_93 = arith.constant dense<0.000000e+00> : vector<128x128xf32>
    %64 = tpu.matmul %61, %63, %cst_93 {dimension_numbers = #tpu.dot_dimension_numbers<[1], [0], [0], [1], [0, 0, 1, 1], [], []>} : vector<128x8xf32>, vector<8x128xf32>, vector<128x128xf32> -> vector<128x128xf32>
    %c0_94 = arith.constant 0 : index
    %c0_95 = arith.constant 0 : index
    %65 = vector.load %arg6[%c0_94, %c0_95] : memref<128x128xf32, #tpu.memory_space<vmem>>, vector<128x128xf32>
    %66 = arith.addf %65, %64 : vector<128x128xf32>
    %c0_96 = arith.constant 0 : index
    %c0_97 = arith.constant 0 : index
    %67 = vector.load %arg6[%c0_96, %c0_97] : memref<128x128xf32, #tpu.memory_space<vmem>>, vector<128x128xf32>
    tpu.vector_store %arg6[%c0_96, %c0_97], %66 {strides = array<i32>} : memref<128x128xf32, #tpu.memory_space<vmem>>, vector<128x128xf32>,
    %c0_98 = arith.constant 0 : index
    %c0_99 = arith.constant 0 : index
    %c1_100 = arith.constant 1 : index
    %c2_101 = arith.constant 2 : index
    %c0_102 = arith.constant 0 : index
    %68 = vector.load %arg2[%c0_98, %c0_99, %c1_100, %c2_101, %c0_102] : memref<1x1x10x18x8xf32, #tpu.memory_space<vmem>>, vector<1x1x8x16x8xf32>
    %69 = vector.shape_cast %68 : vector<1x1x8x16x8xf32> to vector<8x16x8xf32>
    %70 = vector.shape_cast %69 : vector<8x16x8xf32> to vector<128x8xf32>
    %c2_103 = arith.constant 2 : index
    %c3_104 = arith.constant 3 : index
    %c0_105 = arith.constant 0 : index
    %c0_106 = arith.constant 0 : index
    %71 = vector.load %arg3[%c2_103, %c3_104, %c0_105, %c0_106] : memref<4x4x8x128xf32, #tpu.memory_space<vmem>>, vector<1x1x8x128xf32>
    %72 = vector.shape_cast %71 : vector<1x1x8x128xf32> to vector<8x128xf32>
    %cst_107 = arith.constant dense<0.000000e+00> : vector<128x128xf32>
    %73 = tpu.matmul %70, %72, %cst_107 {dimension_numbers = #tpu.dot_dimension_numbers<[1], [0], [0], [1], [0, 0, 1, 1], [], []>} : vector<128x8xf32>, vector<8x128xf32>, vector<128x128xf32> -> vector<128x128xf32>
    %c0_108 = arith.constant 0 : index
    %c0_109 = arith.constant 0 : index
    %74 = vector.load %arg6[%c0_108, %c0_109] : memref<128x128xf32, #tpu.memory_space<vmem>>, vector<128x128xf32>
    %75 = arith.addf %74, %73 : vector<128x128xf32>
    %c0_110 = arith.constant 0 : index
    %c0_111 = arith.constant 0 : index
    %76 = vector.load %arg6[%c0_110, %c0_111] : memref<128x128xf32, #tpu.memory_space<vmem>>, vector<128x128xf32>
    tpu.vector_store %arg6[%c0_110, %c0_111], %75 {strides = array<i32>} : memref<128x128xf32, #tpu.memory_space<vmem>>, vector<128x128xf32>,
    %c0_112 = arith.constant 0 : index
    %c0_113 = arith.constant 0 : index
    %77 = vector.load %arg6[%c0_112, %c0_113] : memref<128x128xf32, #tpu.memory_space<vmem>>, vector<128x128xf32>
    %78 = vector.broadcast %0 : vector<1x128xf32> to vector<128x128xf32>
    %79 = arith.addf %77, %78 : vector<128x128xf32>
    %cst_114 = arith.constant 0.000000e+00 : f32
    %80 = vector.broadcast %cst_114 : f32 to vector<128x128xf32>
    %81 = arith.maximumf %79, %80 : vector<128x128xf32>
    %c0_115 = arith.constant 0 : index
    %c1_116 = arith.constant 1 : index
    %c0_117 = arith.constant 0 : index
    %c0_118 = arith.constant 0 : index
    %82 = vector.load %arg5[%c0_115, %c1_116, %c0_117, %c0_118] : memref<1x4x128x128xf32, #tpu.memory_space<vmem>>, vector<1x1x128x128xf32>
    %83 = vector.shape_cast %82 : vector<1x1x128x128xf32> to vector<128x128xf32>
    %84 = vector.shape_cast %81 : vector<128x128xf32> to vector<1x1x128x128xf32>
    tpu.vector_store %arg5[%c0_115, %c1_116, %c0_117, %c0_118], %84 {strides = array<i32>} : memref<1x4x128x128xf32, #tpu.memory_space<vmem>>, vector<1x1x128x128xf32>,
    %c0_119 = arith.constant 0 : index
    %c0_120 = arith.constant 0 : index
    %c1_121 = arith.constant 1 : index
    %c0_122 = arith.constant 0 : index
    %c0_123 = arith.constant 0 : index
    %85 = vector.load %arg2[%c0_119, %c0_120, %c1_121, %c0_122, %c0_123] : memref<1x1x10x18x8xf32, #tpu.memory_space<vmem>>, vector<1x1x8x16x8xf32>
    %86 = vector.shape_cast %85 : vector<1x1x8x16x8xf32> to vector<8x16x8xf32>
    %87 = vector.shape_cast %86 : vector<8x16x8xf32> to vector<128x8xf32>
    %c1_124 = arith.constant 1 : index
    %c0_125 = arith.constant 0 : index
    %c0_126 = arith.constant 0 : index
    %c0_127 = arith.constant 0 : index
    %88 = vector.load %arg3[%c1_124, %c0_125, %c0_126, %c0_127] : memref<4x4x8x128xf32, #tpu.memory_space<vmem>>, vector<1x1x8x128xf32>
    %89 = vector.shape_cast %88 : vector<1x1x8x128xf32> to vector<8x128xf32>
    %cst_128 = arith.constant dense<0.000000e+00> : vector<128x128xf32>
    %90 = tpu.matmul %87, %89, %cst_128 {dimension_numbers = #tpu.dot_dimension_numbers<[1], [0], [0], [1], [0, 0, 1, 1], [], []>} : vector<128x8xf32>, vector<8x128xf32>, vector<128x128xf32> -> vector<128x128xf32>
    %c0_129 = arith.constant 0 : index
    %c0_130 = arith.constant 0 : index
    %91 = vector.load %arg6[%c0_129, %c0_130] : memref<128x128xf32, #tpu.memory_space<vmem>>, vector<128x128xf32>
    tpu.vector_store %arg6[%c0_129, %c0_130], %90 {strides = array<i32>} : memref<128x128xf32, #tpu.memory_space<vmem>>, vector<128x128xf32>,
    %c0_131 = arith.constant 0 : index
    %c0_132 = arith.constant 0 : index
    %c1_133 = arith.constant 1 : index
    %c1_134 = arith.constant 1 : index
    %c0_135 = arith.constant 0 : index
    %92 = vector.load %arg2[%c0_131, %c0_132, %c1_133, %c1_134, %c0_135] : memref<1x1x10x18x8xf32, #tpu.memory_space<vmem>>, vector<1x1x8x16x8xf32>
    %93 = vector.shape_cast %92 : vector<1x1x8x16x8xf32> to vector<8x16x8xf32>
    %94 = vector.shape_cast %93 : vector<8x16x8xf32> to vector<128x8xf32>
    %c1_136 = arith.constant 1 : index
    %c2_137 = arith.constant 2 : index
    %c0_138 = arith.constant 0 : index
    %c0_139 = arith.constant 0 : index
    %95 = vector.load %arg3[%c1_136, %c2_137, %c0_138, %c0_139] : memref<4x4x8x128xf32, #tpu.memory_space<vmem>>, vector<1x1x8x128xf32>
    %96 = vector.shape_cast %95 : vector<1x1x8x128xf32> to vector<8x128xf32>
    %cst_140 = arith.constant dense<0.000000e+00> : vector<128x128xf32>
    %97 = tpu.matmul %94, %96, %cst_140 {dimension_numbers = #tpu.dot_dimension_numbers<[1], [0], [0], [1], [0, 0, 1, 1], [], []>} : vector<128x8xf32>, vector<8x128xf32>, vector<128x128xf32> -> vector<128x128xf32>
    %c0_141 = arith.constant 0 : index
    %c0_142 = arith.constant 0 : index
    %98 = vector.load %arg6[%c0_141, %c0_142] : memref<128x128xf32, #tpu.memory_space<vmem>>, vector<128x128xf32>
    %99 = arith.addf %98, %97 : vector<128x128xf32>
    %c0_143 = arith.constant 0 : index
    %c0_144 = arith.constant 0 : index
    %100 = vector.load %arg6[%c0_143, %c0_144] : memref<128x128xf32, #tpu.memory_space<vmem>>, vector<128x128xf32>
    tpu.vector_store %arg6[%c0_143, %c0_144], %99 {strides = array<i32>} : memref<128x128xf32, #tpu.memory_space<vmem>>, vector<128x128xf32>,
    %c0_145 = arith.constant 0 : index
    %c0_146 = arith.constant 0 : index
    %c2_147 = arith.constant 2 : index
    %c0_148 = arith.constant 0 : index
    %c0_149 = arith.constant 0 : index
    %101 = vector.load %arg2[%c0_145, %c0_146, %c2_147, %c0_148, %c0_149] : memref<1x1x10x18x8xf32, #tpu.memory_space<vmem>>, vector<1x1x8x16x8xf32>
    %102 = vector.shape_cast %101 : vector<1x1x8x16x8xf32> to vector<8x16x8xf32>
    %103 = vector.shape_cast %102 : vector<8x16x8xf32> to vector<128x8xf32>
    %c3_150 = arith.constant 3 : index
    %c0_151 = arith.constant 0 : index
    %c0_152 = arith.constant 0 : index
    %c0_153 = arith.constant 0 : index
    %104 = vector.load %arg3[%c3_150, %c0_151, %c0_152, %c0_153] : memref<4x4x8x128xf32, #tpu.memory_space<vmem>>, vector<1x1x8x128xf32>
    %105 = vector.shape_cast %104 : vector<1x1x8x128xf32> to vector<8x128xf32>
    %cst_154 = arith.constant dense<0.000000e+00> : vector<128x128xf32>
    %106 = tpu.matmul %103, %105, %cst_154 {dimension_numbers = #tpu.dot_dimension_numbers<[1], [0], [0], [1], [0, 0, 1, 1], [], []>} : vector<128x8xf32>, vector<8x128xf32>, vector<128x128xf32> -> vector<128x128xf32>
    %c0_155 = arith.constant 0 : index
    %c0_156 = arith.constant 0 : index
    %107 = vector.load %arg6[%c0_155, %c0_156] : memref<128x128xf32, #tpu.memory_space<vmem>>, vector<128x128xf32>
    %108 = arith.addf %107, %106 : vector<128x128xf32>
    %c0_157 = arith.constant 0 : index
    %c0_158 = arith.constant 0 : index
    %109 = vector.load %arg6[%c0_157, %c0_158] : memref<128x128xf32, #tpu.memory_space<vmem>>, vector<128x128xf32>
    tpu.vector_store %arg6[%c0_157, %c0_158], %108 {strides = array<i32>} : memref<128x128xf32, #tpu.memory_space<vmem>>, vector<128x128xf32>,
    %c0_159 = arith.constant 0 : index
    %c0_160 = arith.constant 0 : index
    %c2_161 = arith.constant 2 : index
    %c1_162 = arith.constant 1 : index
    %c0_163 = arith.constant 0 : index
    %110 = vector.load %arg2[%c0_159, %c0_160, %c2_161, %c1_162, %c0_163] : memref<1x1x10x18x8xf32, #tpu.memory_space<vmem>>, vector<1x1x8x16x8xf32>
    %111 = vector.shape_cast %110 : vector<1x1x8x16x8xf32> to vector<8x16x8xf32>
    %112 = vector.shape_cast %111 : vector<8x16x8xf32> to vector<128x8xf32>
    %c3_164 = arith.constant 3 : index
    %c2_165 = arith.constant 2 : index
    %c0_166 = arith.constant 0 : index
    %c0_167 = arith.constant 0 : index
    %113 = vector.load %arg3[%c3_164, %c2_165, %c0_166, %c0_167] : memref<4x4x8x128xf32, #tpu.memory_space<vmem>>, vector<1x1x8x128xf32>
    %114 = vector.shape_cast %113 : vector<1x1x8x128xf32> to vector<8x128xf32>
    %cst_168 = arith.constant dense<0.000000e+00> : vector<128x128xf32>
    %115 = tpu.matmul %112, %114, %cst_168 {dimension_numbers = #tpu.dot_dimension_numbers<[1], [0], [0], [1], [0, 0, 1, 1], [], []>} : vector<128x8xf32>, vector<8x128xf32>, vector<128x128xf32> -> vector<128x128xf32>
    %c0_169 = arith.constant 0 : index
    %c0_170 = arith.constant 0 : index
    %116 = vector.load %arg6[%c0_169, %c0_170] : memref<128x128xf32, #tpu.memory_space<vmem>>, vector<128x128xf32>
    %117 = arith.addf %116, %115 : vector<128x128xf32>
    %c0_171 = arith.constant 0 : index
    %c0_172 = arith.constant 0 : index
    %118 = vector.load %arg6[%c0_171, %c0_172] : memref<128x128xf32, #tpu.memory_space<vmem>>, vector<128x128xf32>
    tpu.vector_store %arg6[%c0_171, %c0_172], %117 {strides = array<i32>} : memref<128x128xf32, #tpu.memory_space<vmem>>, vector<128x128xf32>,
    %c0_173 = arith.constant 0 : index
    %c0_174 = arith.constant 0 : index
    %119 = vector.load %arg6[%c0_173, %c0_174] : memref<128x128xf32, #tpu.memory_space<vmem>>, vector<128x128xf32>
    %120 = vector.broadcast %0 : vector<1x128xf32> to vector<128x128xf32>
    %121 = arith.addf %119, %120 : vector<128x128xf32>
    %cst_175 = arith.constant 0.000000e+00 : f32
    %122 = vector.broadcast %cst_175 : f32 to vector<128x128xf32>
    %123 = arith.maximumf %121, %122 : vector<128x128xf32>
    %c0_176 = arith.constant 0 : index
    %c2_177 = arith.constant 2 : index
    %c0_178 = arith.constant 0 : index
    %c0_179 = arith.constant 0 : index
    %124 = vector.load %arg5[%c0_176, %c2_177, %c0_178, %c0_179] : memref<1x4x128x128xf32, #tpu.memory_space<vmem>>, vector<1x1x128x128xf32>
    %125 = vector.shape_cast %124 : vector<1x1x128x128xf32> to vector<128x128xf32>
    %126 = vector.shape_cast %123 : vector<128x128xf32> to vector<1x1x128x128xf32>
    tpu.vector_store %arg5[%c0_176, %c2_177, %c0_178, %c0_179], %126 {strides = array<i32>} : memref<1x4x128x128xf32, #tpu.memory_space<vmem>>, vector<1x1x128x128xf32>,
    %c0_180 = arith.constant 0 : index
    %c0_181 = arith.constant 0 : index
    %c1_182 = arith.constant 1 : index
    %c1_183 = arith.constant 1 : index
    %c0_184 = arith.constant 0 : index
    %127 = vector.load %arg2[%c0_180, %c0_181, %c1_182, %c1_183, %c0_184] : memref<1x1x10x18x8xf32, #tpu.memory_space<vmem>>, vector<1x1x8x16x8xf32>
    %128 = vector.shape_cast %127 : vector<1x1x8x16x8xf32> to vector<8x16x8xf32>
    %129 = vector.shape_cast %128 : vector<8x16x8xf32> to vector<128x8xf32>
    %c1_185 = arith.constant 1 : index
    %c1_186 = arith.constant 1 : index
    %c0_187 = arith.constant 0 : index
    %c0_188 = arith.constant 0 : index
    %130 = vector.load %arg3[%c1_185, %c1_186, %c0_187, %c0_188] : memref<4x4x8x128xf32, #tpu.memory_space<vmem>>, vector<1x1x8x128xf32>
    %131 = vector.shape_cast %130 : vector<1x1x8x128xf32> to vector<8x128xf32>
    %cst_189 = arith.constant dense<0.000000e+00> : vector<128x128xf32>
    %132 = tpu.matmul %129, %131, %cst_189 {dimension_numbers = #tpu.dot_dimension_numbers<[1], [0], [0], [1], [0, 0, 1, 1], [], []>} : vector<128x8xf32>, vector<8x128xf32>, vector<128x128xf32> -> vector<128x128xf32>
    %c0_190 = arith.constant 0 : index
    %c0_191 = arith.constant 0 : index
    %133 = vector.load %arg6[%c0_190, %c0_191] : memref<128x128xf32, #tpu.memory_space<vmem>>, vector<128x128xf32>
    tpu.vector_store %arg6[%c0_190, %c0_191], %132 {strides = array<i32>} : memref<128x128xf32, #tpu.memory_space<vmem>>, vector<128x128xf32>,
    %c0_192 = arith.constant 0 : index
    %c0_193 = arith.constant 0 : index
    %c1_194 = arith.constant 1 : index
    %c2_195 = arith.constant 2 : index
    %c0_196 = arith.constant 0 : index
    %134 = vector.load %arg2[%c0_192, %c0_193, %c1_194, %c2_195, %c0_196] : memref<1x1x10x18x8xf32, #tpu.memory_space<vmem>>, vector<1x1x8x16x8xf32>
    %135 = vector.shape_cast %134 : vector<1x1x8x16x8xf32> to vector<8x16x8xf32>
    %136 = vector.shape_cast %135 : vector<8x16x8xf32> to vector<128x8xf32>
    %c1_197 = arith.constant 1 : index
    %c3_198 = arith.constant 3 : index
    %c0_199 = arith.constant 0 : index
    %c0_200 = arith.constant 0 : index
    %137 = vector.load %arg3[%c1_197, %c3_198, %c0_199, %c0_200] : memref<4x4x8x128xf32, #tpu.memory_space<vmem>>, vector<1x1x8x128xf32>
    %138 = vector.shape_cast %137 : vector<1x1x8x128xf32> to vector<8x128xf32>
    %cst_201 = arith.constant dense<0.000000e+00> : vector<128x128xf32>
    %139 = tpu.matmul %136, %138, %cst_201 {dimension_numbers = #tpu.dot_dimension_numbers<[1], [0], [0], [1], [0, 0, 1, 1], [], []>} : vector<128x8xf32>, vector<8x128xf32>, vector<128x128xf32> -> vector<128x128xf32>
    %c0_202 = arith.constant 0 : index
    %c0_203 = arith.constant 0 : index
    %140 = vector.load %arg6[%c0_202, %c0_203] : memref<128x128xf32, #tpu.memory_space<vmem>>, vector<128x128xf32>
    %141 = arith.addf %140, %139 : vector<128x128xf32>
    %c0_204 = arith.constant 0 : index
    %c0_205 = arith.constant 0 : index
    %142 = vector.load %arg6[%c0_204, %c0_205] : memref<128x128xf32, #tpu.memory_space<vmem>>, vector<128x128xf32>
    tpu.vector_store %arg6[%c0_204, %c0_205], %141 {strides = array<i32>} : memref<128x128xf32, #tpu.memory_space<vmem>>, vector<128x128xf32>,
    %c0_206 = arith.constant 0 : index
    %c0_207 = arith.constant 0 : index
    %c2_208 = arith.constant 2 : index
    %c1_209 = arith.constant 1 : index
    %c0_210 = arith.constant 0 : index
    %143 = vector.load %arg2[%c0_206, %c0_207, %c2_208, %c1_209, %c0_210] : memref<1x1x10x18x8xf32, #tpu.memory_space<vmem>>, vector<1x1x8x16x8xf32>
    %144 = vector.shape_cast %143 : vector<1x1x8x16x8xf32> to vector<8x16x8xf32>
    %145 = vector.shape_cast %144 : vector<8x16x8xf32> to vector<128x8xf32>
    %c3_211 = arith.constant 3 : index
    %c1_212 = arith.constant 1 : index
    %c0_213 = arith.constant 0 : index
    %c0_214 = arith.constant 0 : index
    %146 = vector.load %arg3[%c3_211, %c1_212, %c0_213, %c0_214] : memref<4x4x8x128xf32, #tpu.memory_space<vmem>>, vector<1x1x8x128xf32>
    %147 = vector.shape_cast %146 : vector<1x1x8x128xf32> to vector<8x128xf32>
    %cst_215 = arith.constant dense<0.000000e+00> : vector<128x128xf32>
    %148 = tpu.matmul %145, %147, %cst_215 {dimension_numbers = #tpu.dot_dimension_numbers<[1], [0], [0], [1], [0, 0, 1, 1], [], []>} : vector<128x8xf32>, vector<8x128xf32>, vector<128x128xf32> -> vector<128x128xf32>
    %c0_216 = arith.constant 0 : index
    %c0_217 = arith.constant 0 : index
    %149 = vector.load %arg6[%c0_216, %c0_217] : memref<128x128xf32, #tpu.memory_space<vmem>>, vector<128x128xf32>
    %150 = arith.addf %149, %148 : vector<128x128xf32>
    %c0_218 = arith.constant 0 : index
    %c0_219 = arith.constant 0 : index
    %151 = vector.load %arg6[%c0_218, %c0_219] : memref<128x128xf32, #tpu.memory_space<vmem>>, vector<128x128xf32>
    tpu.vector_store %arg6[%c0_218, %c0_219], %150 {strides = array<i32>} : memref<128x128xf32, #tpu.memory_space<vmem>>, vector<128x128xf32>,
    %c0_220 = arith.constant 0 : index
    %c0_221 = arith.constant 0 : index
    %c2_222 = arith.constant 2 : index
    %c2_223 = arith.constant 2 : index
    %c0_224 = arith.constant 0 : index
    %152 = vector.load %arg2[%c0_220, %c0_221, %c2_222, %c2_223, %c0_224] : memref<1x1x10x18x8xf32, #tpu.memory_space<vmem>>, vector<1x1x8x16x8xf32>
    %153 = vector.shape_cast %152 : vector<1x1x8x16x8xf32> to vector<8x16x8xf32>
    %154 = vector.shape_cast %153 : vector<8x16x8xf32> to vector<128x8xf32>
    %c3_225 = arith.constant 3 : index
    %c3_226 = arith.constant 3 : index
    %c0_227 = arith.constant 0 : index
    %c0_228 = arith.constant 0 : index
    %155 = vector.load %arg3[%c3_225, %c3_226, %c0_227, %c0_228] : memref<4x4x8x128xf32, #tpu.memory_space<vmem>>, vector<1x1x8x128xf32>
    %156 = vector.shape_cast %155 : vector<1x1x8x128xf32> to vector<8x128xf32>
    %cst_229 = arith.constant dense<0.000000e+00> : vector<128x128xf32>
    %157 = tpu.matmul %154, %156, %cst_229 {dimension_numbers = #tpu.dot_dimension_numbers<[1], [0], [0], [1], [0, 0, 1, 1], [], []>} : vector<128x8xf32>, vector<8x128xf32>, vector<128x128xf32> -> vector<128x128xf32>
    %c0_230 = arith.constant 0 : index
    %c0_231 = arith.constant 0 : index
    %158 = vector.load %arg6[%c0_230, %c0_231] : memref<128x128xf32, #tpu.memory_space<vmem>>, vector<128x128xf32>
    %159 = arith.addf %158, %157 : vector<128x128xf32>
    %c0_232 = arith.constant 0 : index
    %c0_233 = arith.constant 0 : index
    %160 = vector.load %arg6[%c0_232, %c0_233] : memref<128x128xf32, #tpu.memory_space<vmem>>, vector<128x128xf32>
    tpu.vector_store %arg6[%c0_232, %c0_233], %159 {strides = array<i32>} : memref<128x128xf32, #tpu.memory_space<vmem>>, vector<128x128xf32>,
    %c0_234 = arith.constant 0 : index
    %c0_235 = arith.constant 0 : index
    %161 = vector.load %arg6[%c0_234, %c0_235] : memref<128x128xf32, #tpu.memory_space<vmem>>, vector<128x128xf32>
    %162 = vector.broadcast %0 : vector<1x128xf32> to vector<128x128xf32>
    %163 = arith.addf %161, %162 : vector<128x128xf32>
    %cst_236 = arith.constant 0.000000e+00 : f32
    %164 = vector.broadcast %cst_236 : f32 to vector<128x128xf32>
    %165 = arith.maximumf %163, %164 : vector<128x128xf32>
    %c0_237 = arith.constant 0 : index
    %c3_238 = arith.constant 3 : index
    %c0_239 = arith.constant 0 : index
    %c0_240 = arith.constant 0 : index
    %166 = vector.load %arg5[%c0_237, %c3_238, %c0_239, %c0_240] : memref<1x4x128x128xf32, #tpu.memory_space<vmem>>, vector<1x1x128x128xf32>
    %167 = vector.shape_cast %166 : vector<1x1x128x128xf32> to vector<128x128xf32>
    %168 = vector.shape_cast %165 : vector<128x128xf32> to vector<1x1x128x128xf32>
    tpu.vector_store %arg5[%c0_237, %c3_238, %c0_239, %c0_240], %168 {strides = array<i32>} : memref<1x4x128x128xf32, #tpu.memory_space<vmem>>, vector<1x1x128x128xf32>,
    return
  }
  func.func @transform_0(%arg0: i32, %arg1: i32) -> (i32, i32, i32, i32, i32) {
    %c0_i32 = arith.constant 0 : i32
    %c0_i32_0 = arith.constant 0 : i32
    %c0_i32_1 = arith.constant 0 : i32
    %c0_i32_2 = arith.constant 0 : i32
    return %arg0, %arg1, %c0_i32, %c0_i32_0, %c0_i32_1 : i32, i32, i32, i32, i32
  }
  func.func @transform_1(%arg0: i32, %arg1: i32) -> (i32, i32, i32, i32) {
    %c0_i32 = arith.constant 0 : i32
    %c0_i32_0 = arith.constant 0 : i32
    %c0_i32_1 = arith.constant 0 : i32
    %c0_i32_2 = arith.constant 0 : i32
    %c0_i32_3 = arith.constant 0 : i32
    return %c0_i32, %c0_i32_0, %c0_i32_1, %c0_i32_2 : i32, i32, i32, i32
  }
  func.func @transform_2(%arg0: i32, %arg1: i32) -> (i32, i32) {
    %c0_i32 = arith.constant 0 : i32
    %c0_i32_0 = arith.constant 0 : i32
    %c0_i32_1 = arith.constant 0 : i32
    return %c0_i32, %c0_i32_0 : i32, i32
  }
  func.func @transform_3(%arg0: i32, %arg1: i32) -> (i32, i32, i32, i32) {
    %c0_i32 = arith.constant 0 : i32
    %c0_i32_0 = arith.constant 0 : i32
    %c0_i32_1 = arith.constant 0 : i32
    return %arg0, %c0_i32, %arg1, %c0_i32_0 : i32, i32, i32, i32
  }
}

</mosaic_0001>

<bundles_post_ra>
// kernel: tpu_custom_call.1
= control target key start
LH: loop header
LB: loop body
LE: loop exit
PB: predicated region body
PF: predicated region fallthrough
CT: control target
= control target key end

     0   :  { %8 = vsyncpa [#allocation4], 0  ;;  %s4949_s0 = inlined_call_operand.vmem [shape: f32[2,2,10,18,8], index: 0, kind: input, shape index: {}]   ;;  %s4950_s1 = inlined_call_operand.vmem [shape: f32[4,4,8,128], index: 1, kind: input, shape index: {}]   ;;  %s4951_s2 = inlined_call_operand.vmem [shape: f32[1,128], index: 2, kind: input, shape index: {}]   ;;  %s4952_s3 = inlined_call_operand.hbm [shape: f32[2,4,256,128], index: 3, kind: output, shape index: {}]  }
   0x1   :  { %10 = vsyncpa [#allocation4 + $0x1], 0  ;;  %s4032_s12 = smov 0   ;;  %s4034_s13 = smov 0  }
   0x2   :  { %s4036_s14 = smov 0   ;;  %s4038_s15 = smov 0  }
   0x3   :  { %s4040_s16 = smov 0   ;;  %s4042_s17 = smov 0  }
   0x4   :  { %s4044_s18 = smov 0   ;;  %s4046_s19 = smov 0  }
   0x5 LB: > { %s3325_s20 = sadd.s32 4294967295, %s4003_s19   ;;  %s3326_s21 = sadd.s32 4294967294, %s4003_s19   ;;  %s4003_s19 = sphi %s4046_s19, %s16_s19   ;;  %s3999_s18 = sphi %s4044_s18, %s4961_s18   ;;  %s3995_s17 = sphi %s4042_s17, %s4960_s17   ;;  %s3991_s16 = sphi %s4040_s16, %s4959_s16   ;;  %s3987_s15 = sphi %s4038_s15, %s4958_s15   ;;  %s3983_s14 = sphi %s4036_s14, %s4957_s14   ;;  %s3979_s13 = sphi %s4034_s13, %s4956_s13   ;;  %s3975_s12 = sphi %s4032_s12, %s4955_s12  }
   0x6   : > { %s25_s22 = sadd.s32 1, %s3995_s17  ;;  %s28_s23 = sadd.s32 1, %s3999_s18 }
   0x7   : > { %p26_p0 = scmp.ge.s32.totalorder %s25_s22, 2  ;;  %p117_p1 = scmp.ne.s32.totalorder %s3983_s14, %s3979_s13 }
   0x8   : > { %p118_p2 = scmp.eq.s32.totalorder %s3325_s20, 3  ;;  %p123_p5 = scmp.ne.s32.totalorder %s3979_s13, %s3975_s12 }
   0x9   : > { %s4963_s22 = smov (%p26_p0, %s25_s22), 0  ;;  %s4965_s23 = smov (!%p26_p0, %s28_s23), %s3999_s18 }
   0xa   : > { %s103_s24 = ssub.s32 %s3995_s17, %s4963_s22  ;;  %p4083_p3 = por %p118_p2, %p117_p1 }
   0xb   : > { %p30_p4 = scmp.ge.s32.totalorder %s4965_s23, 2  ;;  %p124_p6 = scmp.eq.s32.totalorder %s3326_s21, 3 }
   0xc   : > { %p3329_p7 = scmp.ge.s32.totalorder %s4003_s19, 1  ;;  %p160_p9 = scmp.lt.s32.totalorder %s4003_s19, 5 }
   0xd   : > { %s4967_s23 = smov (%p30_p4, %s4965_s23), 0  ;;  %p4092_p8 = por %p124_p6, %p123_p5 }
   0xe   : > { %s102_s27 = ssub.s32 %s3999_s18, %s4967_s23  ;;  %s107_s28 = sadd.s32 1, %s3983_s14 }
   0xf   : > { %s104_s29 = sor.u32 %s103_s24, %s102_s27  ;;  %p161_p10 = pnand %p3329_p7, %p160_p9 }
  0x10   : > { %p105_p11 = scmp.eq.s32.totalorder %s104_s29, 0  ;;  %p188_p12 = scmp.lt.s32.totalorder (!%p161_p10), %s3991_s16, 1 }
  0x11   : > { %164 = sbr.rel (%p161_p10) target bundleno = 687 (0x2af), region = 32  ;;  %p190_p13 = scmp.lt.s32.totalorder (!%p161_p10), %s3987_s15, 1 }
  0x12   : > { %s4101_s30 = scalar_select %p105_p11, %s3983_s14, %s107_s28  }
  0x16   : > { %v3381_v0 = vld [vmem:[%s4950_s1 + $0x40] sm:$0xff]  ;;  %v3481_v1 = vld [vmem:[%s4950_s1 + $0x48] sm:$0xff]  ;;  %v3414_v2 = vld [vmem:[%s4950_s1 + $0x50] sm:$0xff]  ;;  %s189_s28 = scalar_select %p188_p12, %s3991_s16, 1  ;;  %vm216_vm0 = vcmask 64512  }
  0x17   : > { %607 = vmatpush.msra.mxu2 %v3381_v0  ;;  %786 = vmatpush.msra.mxu3 %v3414_v2  ;;  %v3514_v3 = vld [vmem:[%s4950_s1 + $0x58] sm:$0xff]  ;;  %v215_v4 = vld [vmem:[%s4950_s1] sm:$0xff]  ;;  %v3348_v5 = vld [vmem:[%s4950_s1 + $0x10] sm:$0xff]  ;;  %s191_s7 = scalar_select %p190_p13, %s3987_s15, 1 }
  0x18   : > { %v3431_v6 = vld [vmem:[%s4950_s1 + $0x8] sm:$0xff]  ;;  %v3448_v7 = vld [vmem:[%s4950_s1 + $0x18] sm:$0xff]  ;;  %280 = vmatpush.msra.mxu0 %v215_v4  ;;  %427 = vmatpush.msra.mxu1 %v3348_v5  ;;  %s3850_s8 = smul.u32 60, %s189_s28  ;;  %v3629_v38 = vld [vmem:[%s4950_s1 + $0x60] sm:$0xff] }
  0x19   : > { %1358 = vmatpush.msrb.mxu2 %v3481_v1  ;;  %1537 = vmatpush.msrb.mxu3 %v3514_v3  ;;  %s3849_s9 = smul.u32 30, %s191_s7  ;;  %v3662_v39 = vld [vmem:[%s4950_s1 + $0x70] sm:$0xff]  ;;  %v3563_v40 = vld [vmem:[%s4950_s1 + $0x20] sm:$0xff] }
  0x1a   : > { %1032 = vmatpush.msrb.mxu0 %v3431_v6  ;;  %1179 = vmatpush.msrb.mxu1 %v3448_v7  ;;  %v3596_v41 = vld [vmem:[%s4950_s1 + $0x30] sm:$0xff]  ;;  %v4376_v56 = vld [vmem:[%s4951_s2] ss:$0 sm:$0xff] }
  0x1b   : > { %s194_s10 = sadd.s32 %s3850_s8, %s3849_s9  ;;  %s185_s9 = sand.u32 1, %s3979_s13  }
  0x1c   : > { %s3331_s11 = sshll.u32 %s194_s10, 3  ;;  %s3330_s20 = sshll.u32 %s185_s9, 9 }
  0x1d   : > { %s4134_s24 = scalar_lea.vmem %s4949_s0, %s3331_s11  ;;  %s4389_s21 = scalar_lea.vmem [#allocation3], %s3330_s20 }
  0x1e   : > { %v4137_v8 = vld [vmem:[%s4134_s24 + $0x18] sm:$0xff]  ;;  %v199_v10 = vld [vmem:[%s4134_s24] sm:$0xff]  ;;  %v200_v14 = vld [vmem:[%s4134_s24 + $0x8] sm:$0xff] }
  0x1f   : > { %v4140_v9 = vld [vmem:[%s4134_s24 + $0x19] sm:$0xff]  ;;  %3382 = vmatmul.msk.f32.vlgmr.msra.gmra.mxu2 %vm216_vm0, %v4137_v8  ;;  %v4148_v11 = vld [vmem:[%s4134_s24 + $0x1] sm:$0xff]  ;;  %3332 = vmatmul.msk.f32.vlgmr.msra.gmra.mxu0 %vm216_vm0, %v199_v10  ;;  %v4161_v15 = vld [vmem:[%s4134_s24 + $0x9] sm:$0xff] }
  0x20   : > { %3415 = vmatmul.msk.f32.vlgmr.msra.gmra.mxu3 %vm216_vm0, %v4140_v9  ;;  %3349 = vmatmul.msk.f32.vlgmr.msra.gmra.mxu1 %vm216_vm0, %v4148_v11  ;;  %v4154_v12 = vld [vmem:[%s4134_s24 + $0x20] sm:$0xff]  ;;  %v4171_v16 = vld [vmem:[%s4134_s24 + $0x30] sm:$0xff]  ;;  %v4185_v18 = vld [vmem:[%s4134_s24 + $0x38] sm:$0xff] }
  0x21   : > { %v4157_v13 = vld [vmem:[%s4134_s24 + $0x21] sm:$0xff]  ;;  %v4174_v17 = vld [vmem:[%s4134_s24 + $0x31] sm:$0xff]  ;;  %v4188_v19 = vld [vmem:[%s4134_s24 + $0x39] sm:$0xff]  ;;  %2108 = vmatpush.msra.mxu2 %v3629_v38  ;;  %2287 = vmatpush.msra.mxu3 %v3662_v39 }
  0x22   : > { %v4199_v20 = vld [vmem:[%s4134_s24 + $0x48] sm:$0xff]  ;;  %v4213_v22 = vld [vmem:[%s4134_s24 + $0x50] sm:$0xff]  ;;  %v4227_v24 = vld [vmem:[%s4134_s24 + $0x60] sm:$0xff]  ;;  %1781 = vmatpush.msra.mxu0 %v3563_v40  ;;  %1928 = vmatpush.msra.mxu1 %v3596_v41 }
  0x23   : > { %v4202_v21 = vld [vmem:[%s4134_s24 + $0x49] sm:$0xff]  ;;  %v4216_v23 = vld [vmem:[%s4134_s24 + $0x51] sm:$0xff]  ;;  %v4230_v25 = vld [vmem:[%s4134_s24 + $0x61] sm:$0xff] }
  0x24   : > { %v4241_v26 = vld [vmem:[%s4134_s24 + $0x68] sm:$0xff]  ;;  %v4255_v28 = vld [vmem:[%s4134_s24 + $0x78] sm:$0xff]  ;;  %v4269_v30 = vld [vmem:[%s4134_s24 + $0x80] sm:$0xff] }
  0x25   : > { %v4244_v27 = vld [vmem:[%s4134_s24 + $0x69] sm:$0xff]  ;;  %v4258_v29 = vld [vmem:[%s4134_s24 + $0x79] sm:$0xff]  ;;  %v4272_v31 = vld [vmem:[%s4134_s24 + $0x81] sm:$0xff] }
  0x26   : > { %v4283_v32 = vld [vmem:[%s4134_s24 + $0x90] sm:$0xff]  ;;  %v4297_v34 = vld [vmem:[%s4134_s24 + $0x98] sm:$0xff]  ;;  %v3377_v36 = vld [vmem:[%s4134_s24 + $0xa8] sm:$0xff] }
  0x27   : > { %3383 = vmatmul.msk.f32.gmra.mxu2 %vm216_vm0, %v4154_v12  ;;  %3333 = vmatmul.msk.f32.gmra.mxu0 %vm216_vm0, %v200_v14  ;;  %v4286_v33 = vld [vmem:[%s4134_s24 + $0x91] sm:$0xff]  ;;  %v4300_v35 = vld [vmem:[%s4134_s24 + $0x99] sm:$0xff]  ;;  %v4312_v37 = vld [vmem:[%s4134_s24 + $0xa9] sm:$0xff] }
  0x28   : > { %3416 = vmatmul.msk.f32.gmra.mxu3 %vm216_vm0, %v4157_v13  ;;  %3350 = vmatmul.msk.f32.gmra.mxu1 %vm216_vm0, %v4161_v15  ;;  %v3378_v42 = vld [vmem:[%s4134_s24 + $0xb0] sm:$0xff]  ;;  %v3379_v44 = vld [vmem:[%s4134_s24 + $0xc0] sm:$0xff]  ;;  %v3380_v46 = vld [vmem:[%s4134_s24 + $0xc8] sm:$0xff] }
  0x29   : > { %v4335_v43 = vld [vmem:[%s4134_s24 + $0xb1] sm:$0xff]  ;;  %v4346_v45 = vld [vmem:[%s4134_s24 + $0xc1] sm:$0xff]  ;;  %v4356_v47 = vld [vmem:[%s4134_s24 + $0xc9] sm:$0xff] }
  0x2a   : > { %v3498_v48 = vld [vmem:[%s4134_s24 + $0x1a] sm:$0xff]  ;;  %v1098_v51 = vld [vmem:[%s4134_s24 + $0x2] sm:$0xff]  ;;  %v1099_v61 = vld [vmem:[%s4134_s24 + $0xa] sm:$0xff] }
  0x2b   : > { %v3499_v57 = vld [vmem:[%s4134_s24 + $0x22] sm:$0xff]  ;;  %v3500_v4 = vld [vmem:[%s4134_s24 + $0x32] sm:$0xff]  ;;  %v3501_v39 = vld [vmem:[%s4134_s24 + $0x3a] sm:$0xff] }
  0x2f   : > { %3384 = vmatmul.msk.f32.gmra.mxu2 %vm216_vm0, %v4171_v16  ;;  %3334 = vmatmul.msk.f32.gmra.mxu0 %vm216_vm0, %v4137_v8 }
  0x30   : > { %3417 = vmatmul.msk.f32.gmra.mxu3 %vm216_vm0, %v4174_v17  ;;  %3351 = vmatmul.msk.f32.gmra.mxu1 %vm216_vm0, %v4140_v9 }
  0x37   : > { %3385 = vmatmul.msk.f32.gmra.mxu2 %vm216_vm0, %v4185_v18  ;;  %3335 = vmatmul.msk.f32.gmra.mxu0 %vm216_vm0, %v4154_v12 }
  0x38   : > { %3418 = vmatmul.msk.f32.gmra.mxu3 %vm216_vm0, %v4188_v19  ;;  %3352 = vmatmul.msk.f32.gmra.mxu1 %vm216_vm0, %v4157_v13 }
  0x3f   : > { %3386 = vmatmul.msk.f32.gmra.mxu2 %vm216_vm0, %v4199_v20  ;;  %3336 = vmatmul.msk.f32.gmra.mxu0 %vm216_vm0, %v4171_v16 }
  0x40   : > { %3419 = vmatmul.msk.f32.gmra.mxu3 %vm216_vm0, %v4202_v21  ;;  %3353 = vmatmul.msk.f32.gmra.mxu1 %vm216_vm0, %v4174_v17 }
  0x47   : > { %3387 = vmatmul.msk.f32.gmra.mxu2 %vm216_vm0, %v4213_v22  ;;  %3337 = vmatmul.msk.f32.gmra.mxu0 %vm216_vm0, %v4185_v18 }
  0x48   : > { %3420 = vmatmul.msk.f32.gmra.mxu3 %vm216_vm0, %v4216_v23  ;;  %3354 = vmatmul.msk.f32.gmra.mxu1 %vm216_vm0, %v4188_v19 }
  0x4f   : > { %3388 = vmatmul.msk.f32.gmra.mxu2 %vm216_vm0, %v4227_v24  ;;  %3338 = vmatmul.msk.f32.gmra.mxu0 %vm216_vm0, %v4199_v20 }
  0x50   : > { %3421 = vmatmul.msk.f32.gmra.mxu3 %vm216_vm0, %v4230_v25  ;;  %3355 = vmatmul.msk.f32.gmra.mxu1 %vm216_vm0, %v4202_v21 }
  0x57   : > { %3389 = vmatmul.msk.f32.gmra.mxu2 %vm216_vm0, %v4241_v26  ;;  %3339 = vmatmul.msk.f32.gmra.mxu0 %vm216_vm0, %v4213_v22 }
  0x58   : > { %3422 = vmatmul.msk.f32.gmra.mxu3 %vm216_vm0, %v4244_v27  ;;  %3356 = vmatmul.msk.f32.gmra.mxu1 %vm216_vm0, %v4216_v23 }
  0x5f   : > { %3390 = vmatmul.msk.f32.gmra.mxu2 %vm216_vm0, %v4255_v28  ;;  %3340 = vmatmul.msk.f32.gmra.mxu0 %vm216_vm0, %v4227_v24 }
  0x60   : > { %3423 = vmatmul.msk.f32.gmra.mxu3 %vm216_vm0, %v4258_v29  ;;  %3357 = vmatmul.msk.f32.gmra.mxu1 %vm216_vm0, %v4230_v25 }
  0x67   : > { %3391 = vmatmul.msk.f32.gmra.mxu2 %vm216_vm0, %v4269_v30  ;;  %3341 = vmatmul.msk.f32.gmra.mxu0 %vm216_vm0, %v4241_v26 }
  0x68   : > { %3424 = vmatmul.msk.f32.gmra.mxu3 %vm216_vm0, %v4272_v31  ;;  %3358 = vmatmul.msk.f32.gmra.mxu1 %vm216_vm0, %v4244_v27 }
  0x6f   : > { %3392 = vmatmul.msk.f32.gmra.mxu2 %vm216_vm0, %v4283_v32  ;;  %3342 = vmatmul.msk.f32.gmra.mxu0 %vm216_vm0, %v4255_v28 }
  0x70   : > { %3425 = vmatmul.msk.f32.gmra.mxu3 %vm216_vm0, %v4286_v33  ;;  %3359 = vmatmul.msk.f32.gmra.mxu1 %vm216_vm0, %v4258_v29 }
  0x77   : > { %3393 = vmatmul.msk.f32.gmra.mxu2 %vm216_vm0, %v4297_v34  ;;  %3343 = vmatmul.msk.f32.gmra.mxu0 %vm216_vm0, %v4269_v30 }
  0x78   : > { %3426 = vmatmul.msk.f32.gmra.mxu3 %vm216_vm0, %v4300_v35  ;;  %3360 = vmatmul.msk.f32.gmra.mxu1 %vm216_vm0, %v4272_v31 }
  0x7f   : > { %3394 = vmatmul.msk.f32.gmra.mxu2 %vm216_vm0, %v3377_v36  ;;  %3344 = vmatmul.msk.f32.gmra.mxu0 %vm216_vm0, %v4283_v32 }
  0x80   : > { %3427 = vmatmul.msk.f32.gmra.mxu3 %vm216_vm0, %v4312_v37  ;;  %3361 = vmatmul.msk.f32.gmra.mxu1 %vm216_vm0, %v4286_v33 }
  0x87   : > { %3395 = vmatmul.msk.f32.gmra.mxu2 %vm216_vm0, %v3378_v42  ;;  %3345 = vmatmul.msk.f32.gmra.mxu0 %vm216_vm0, %v4297_v34 }
  0x88   : > { %3428 = vmatmul.msk.f32.gmra.mxu3 %vm216_vm0, %v4335_v43  ;;  %3362 = vmatmul.msk.f32.gmra.mxu1 %vm216_vm0, %v4300_v35 }
  0x8f   : > { %3396 = vmatmul.msk.f32.gmra.mxu2 %vm216_vm0, %v3379_v44  ;;  %3346 = vmatmul.msk.f32.gmra.mxu0 %vm216_vm0, %v3377_v36 }
  0x90   : > { %3429 = vmatmul.msk.f32.gmra.mxu3 %vm216_vm0, %v4346_v45  ;;  %3363 = vmatmul.msk.f32.gmra.mxu1 %vm216_vm0, %v4312_v37 }
  0x97   : > { %3397 = vmatmul.msk.f32.gmra.mxu2 %vm216_vm0, %v3380_v46  ;;  %3347 = vmatmul.msk.f32.gmra.mxu0 %vm216_vm0, %v3378_v42 }
  0x98   : > { %3430 = vmatmul.msk.f32.gmra.mxu3 %vm216_vm0, %v4356_v47  ;;  %3364 = vmatmul.msk.f32.gmra.mxu1 %vm216_vm0, %v4335_v43 }
  0x9c   : > { %v282_v49 = vpop.f32.mrf.mxu0 }
  0x9d   : > { %v429_v50 = vpop.f32.mrf.mxu1 }
  0x9e   : > { %v493_v52 = vadd.f32 %v429_v50, %v282_v49 }
  0x9f   : > { %3482 = vmatmul.msk.f32.vlgmr.msrb.gmra.mxu2 %vm216_vm0, %v4140_v9  ;;  %3432 = vmatmul.msk.f32.vlgmr.msrb.gmra.mxu0 %vm216_vm0, %v4148_v11 }
  0xa0   : > { %3515 = vmatmul.msk.f32.vlgmr.msrb.gmra.mxu3 %vm216_vm0, %v3498_v48  ;;  %3449 = vmatmul.msk.f32.vlgmr.msrb.gmra.mxu1 %vm216_vm0, %v1098_v51 }
  0xa2   : > { %v609_v53 = vpop.f32.mrf.mxu2 }
  0xa3   : > { %v788_v54 = vpop.f32.mrf.mxu3  ;;  %v673_v55 = vadd.f32 %v609_v53, %v493_v52  ;;  %v3502_v52 = vld [vmem:[%s4134_s24 + $0x4a] sm:$0xff] }
  0xa4   : > { %v285_v59 = vpop.f32.mrf.mxu0 }
  0xa5   : > { %v852_v58 = vadd.f32 %v788_v54, %v673_v55  ;;  %v432_v60 = vpop.f32.mrf.mxu1 }
  0xa6   : > { %v494_v63 = vadd.f32 %v432_v60, %v285_v59 }
  0xa7   : > { %v903_v62 = vadd.f32 %v4376_v56, %v852_v58  ;;  %3483 = vmatmul.msk.f32.gmra.mxu2 %vm216_vm0, %v4157_v13  ;;  %3433 = vmatmul.msk.f32.gmra.mxu0 %vm216_vm0, %v4161_v15 }
  0xa8   : > { %3516 = vmatmul.msk.f32.gmra.mxu3 %vm216_vm0, %v3499_v57  ;;  %3450 = vmatmul.msk.f32.gmra.mxu1 %vm216_vm0, %v1099_v61 }
  0xa9   : > { %v919_v0 = vmax.f32 %v903_v62, 0.0 }
  0xaa   : > { %v612_v1 = vpop.f32.mrf.mxu2 }
  0xab   : > { %v791_v2 = vpop.f32.mrf.mxu3  ;;  %935 = vst [vmem:[%s4389_s21] sm:$0xff] %v919_v0  ;;  %v674_v3 = vadd.f32 %v612_v1, %v494_v63  ;;  %v3503_v63 = vld [vmem:[%s4134_s24 + $0x52] sm:$0xff] }
  0xac   : > { %v288_v6 = vpop.f32.mrf.mxu0 }
  0xad   : > { %v853_v5 = vadd.f32 %v791_v2, %v674_v3  ;;  %v435_v7 = vpop.f32.mrf.mxu1 }
  0xae   : > { %v495_v11 = vadd.f32 %v435_v7, %v288_v6 }
  0xaf   : > { %v904_v10 = vadd.f32 %v4376_v56, %v853_v5  ;;  %3484 = vmatmul.msk.f32.gmra.mxu2 %vm216_vm0, %v4174_v17  ;;  %3434 = vmatmul.msk.f32.gmra.mxu0 %vm216_vm0, %v4140_v9 }
  0xb0   : > { %3517 = vmatmul.msk.f32.gmra.mxu3 %vm216_vm0, %v3500_v4  ;;  %3451 = vmatmul.msk.f32.gmra.mxu1 %vm216_vm0, %v3498_v48 }
  0xb1   : > { %v920_v14 = vmax.f32 %v904_v10, 0.0 }
  0xb2   : > { %v615_v15 = vpop.f32.mrf.mxu2 }
  0xb3   : > { %v794_v36 = vpop.f32.mrf.mxu3  ;;  %936 = vst [vmem:[%s4389_s21 + $0x8] sm:$0xff] %v920_v14  ;;  %v675_v38 = vadd.f32 %v615_v15, %v495_v11  ;;  %v3504_v11 = vld [vmem:[%s4134_s24 + $0x62] sm:$0xff] }
  0xb4   : > { %v291_v41 = vpop.f32.mrf.mxu0 }
  0xb5   : > { %v854_v40 = vadd.f32 %v794_v36, %v675_v38  ;;  %v438_v42 = vpop.f32.mrf.mxu1 }
  0xb6   : > { %v496_v46 = vadd.f32 %v438_v42, %v291_v41 }
  0xb7   : > { %v905_v44 = vadd.f32 %v4376_v56, %v854_v40  ;;  %3485 = vmatmul.msk.f32.gmra.mxu2 %vm216_vm0, %v4188_v19  ;;  %3435 = vmatmul.msk.f32.gmra.mxu0 %vm216_vm0, %v4157_v13 }
  0xb8   : > { %3518 = vmatmul.msk.f32.gmra.mxu3 %vm216_vm0, %v3501_v39  ;;  %3452 = vmatmul.msk.f32.gmra.mxu1 %vm216_vm0, %v3499_v57 }
  0xb9   : > { %v921_v48 = vmax.f32 %v905_v44, 0.0 }
  0xba   : > { %v618_v49 = vpop.f32.mrf.mxu2 }
  0xbb   : > { %v797_v50 = vpop.f32.mrf.mxu3  ;;  %937 = vst [vmem:[%s4389_s21 + $0x10] sm:$0xff] %v921_v48  ;;  %v676_v51 = vadd.f32 %v618_v49, %v496_v46  ;;  %v3505_v46 = vld [vmem:[%s4134_s24 + $0x6a] sm:$0xff] }
  0xbc   : > { %v294_v54 = vpop.f32.mrf.mxu0 }
  0xbd   : > { %v855_v53 = vadd.f32 %v797_v50, %v676_v51  ;;  %v441_v55 = vpop.f32.mrf.mxu1 }
  0xbe   : > { %v497_v59 = vadd.f32 %v441_v55, %v294_v54 }
  0xbf   : > { %v906_v58 = vadd.f32 %v4376_v56, %v855_v53  ;;  %3486 = vmatmul.msk.f32.gmra.mxu2 %vm216_vm0, %v4202_v21  ;;  %3436 = vmatmul.msk.f32.gmra.mxu0 %vm216_vm0, %v4174_v17 }
  0xc0   : > { %3519 = vmatmul.msk.f32.gmra.mxu3 %vm216_vm0, %v3502_v52  ;;  %3453 = vmatmul.msk.f32.gmra.mxu1 %vm216_vm0, %v3500_v4 }
  0xc1   : > { %v922_v57 = vmax.f32 %v906_v58, 0.0 }
  0xc2   : > { %v621_v60 = vpop.f32.mrf.mxu2 }
  0xc3   : > { %v800_v61 = vpop.f32.mrf.mxu3  ;;  %938 = vst [vmem:[%s4389_s21 + $0x18] sm:$0xff] %v922_v57  ;;  %v677_v62 = vadd.f32 %v621_v60, %v497_v59  ;;  %v3506_v59 = vld [vmem:[%s4134_s24 + $0x7a] sm:$0xff] }
  0xc4   : > { %v297_v1 = vpop.f32.mrf.mxu0 }
  0xc5   : > { %v856_v0 = vadd.f32 %v800_v61, %v677_v62  ;;  %v444_v2 = vpop.f32.mrf.mxu1 }
  0xc6   : > { %v498_v5 = vadd.f32 %v444_v2, %v297_v1 }
  0xc7   : > { %v907_v3 = vadd.f32 %v4376_v56, %v856_v0  ;;  %3487 = vmatmul.msk.f32.gmra.mxu2 %vm216_vm0, %v4216_v23  ;;  %3437 = vmatmul.msk.f32.gmra.mxu0 %vm216_vm0, %v4188_v19 }
  0xc8   : > { %3520 = vmatmul.msk.f32.gmra.mxu3 %vm216_vm0, %v3503_v63  ;;  %3454 = vmatmul.msk.f32.gmra.mxu1 %vm216_vm0, %v3501_v39 }
  0xc9   : > { %v923_v4 = vmax.f32 %v907_v3, 0.0 }
  0xca   : > { %v624_v6 = vpop.f32.mrf.mxu2 }
  0xcb   : > { %v803_v7 = vpop.f32.mrf.mxu3  ;;  %939 = vst [vmem:[%s4389_s21 + $0x20] sm:$0xff] %v923_v4  ;;  %v678_v10 = vadd.f32 %v624_v6, %v498_v5  ;;  %v3507_v5 = vld [vmem:[%s4134_s24 + $0x82] sm:$0xff] }
  0xcc   : > { %v300_v15 = vpop.f32.mrf.mxu0 }
  0xcd   : > { %v857_v14 = vadd.f32 %v803_v7, %v678_v10  ;;  %v447_v36 = vpop.f32.mrf.mxu1 }
  0xce   : > { %v499_v40 = vadd.f32 %v447_v36, %v300_v15 }
  0xcf   : > { %v908_v38 = vadd.f32 %v4376_v56, %v857_v14  ;;  %3488 = vmatmul.msk.f32.gmra.mxu2 %vm216_vm0, %v4230_v25  ;;  %3438 = vmatmul.msk.f32.gmra.mxu0 %vm216_vm0, %v4202_v21 }
  0xd0   : > { %3521 = vmatmul.msk.f32.gmra.mxu3 %vm216_vm0, %v3504_v11  ;;  %3455 = vmatmul.msk.f32.gmra.mxu1 %vm216_vm0, %v3502_v52 }
  0xd1   : > { %v924_v39 = vmax.f32 %v908_v38, 0.0 }
  0xd2   : > { %v627_v41 = vpop.f32.mrf.mxu2 }
  0xd3   : > { %v806_v42 = vpop.f32.mrf.mxu3  ;;  %940 = vst [vmem:[%s4389_s21 + $0x28] sm:$0xff] %v924_v39  ;;  %v679_v44 = vadd.f32 %v627_v41, %v499_v40  ;;  %v3508_v40 = vld [vmem:[%s4134_s24 + $0x92] sm:$0xff] }
  0xd4   : > { %v303_v49 = vpop.f32.mrf.mxu0 }
  0xd5   : > { %v858_v48 = vadd.f32 %v806_v42, %v679_v44  ;;  %v450_v50 = vpop.f32.mrf.mxu1 }
  0xd6   : > { %v500_v53 = vadd.f32 %v450_v50, %v303_v49 }
  0xd7   : > { %v909_v51 = vadd.f32 %v4376_v56, %v858_v48  ;;  %3489 = vmatmul.msk.f32.gmra.mxu2 %vm216_vm0, %v4244_v27  ;;  %3439 = vmatmul.msk.f32.gmra.mxu0 %vm216_vm0, %v4216_v23 }
  0xd8   : > { %3522 = vmatmul.msk.f32.gmra.mxu3 %vm216_vm0, %v3505_v46  ;;  %3456 = vmatmul.msk.f32.gmra.mxu1 %vm216_vm0, %v3503_v63 }
  0xd9   : > { %v925_v52 = vmax.f32 %v909_v51, 0.0 }
  0xda   : > { %v630_v54 = vpop.f32.mrf.mxu2 }
  0xdb   : > { %v809_v55 = vpop.f32.mrf.mxu3  ;;  %941 = vst [vmem:[%s4389_s21 + $0x30] sm:$0xff] %v925_v52  ;;  %v680_v58 = vadd.f32 %v630_v54, %v500_v53  ;;  %v3509_v53 = vld [vmem:[%s4134_s24 + $0x9a] sm:$0xff] }
  0xdc   : > { %v306_v60 = vpop.f32.mrf.mxu0 }
  0xdd   : > { %v859_v57 = vadd.f32 %v809_v55, %v680_v58  ;;  %v453_v61 = vpop.f32.mrf.mxu1 }
  0xde   : > { %v501_v0 = vadd.f32 %v453_v61, %v306_v60 }
  0xdf   : > { %v910_v62 = vadd.f32 %v4376_v56, %v859_v57  ;;  %3490 = vmatmul.msk.f32.gmra.mxu2 %vm216_vm0, %v4258_v29  ;;  %3440 = vmatmul.msk.f32.gmra.mxu0 %vm216_vm0, %v4230_v25 }
  0xe0   : > { %3523 = vmatmul.msk.f32.gmra.mxu3 %vm216_vm0, %v3506_v59  ;;  %3457 = vmatmul.msk.f32.gmra.mxu1 %vm216_vm0, %v3504_v11 }
  0xe1   : > { %v926_v63 = vmax.f32 %v910_v62, 0.0 }
  0xe2   : > { %v633_v1 = vpop.f32.mrf.mxu2 }
  0xe3   : > { %v812_v2 = vpop.f32.mrf.mxu3  ;;  %942 = vst [vmem:[%s4389_s21 + $0x38] sm:$0xff] %v926_v63  ;;  %v681_v3 = vadd.f32 %v633_v1, %v501_v0  ;;  %v3510_v0 = vld [vmem:[%s4134_s24 + $0xaa] sm:$0xff] }
  0xe4   : > { %v309_v6 = vpop.f32.mrf.mxu0 }
  0xe5   : > { %v860_v4 = vadd.f32 %v812_v2, %v681_v3  ;;  %v456_v7 = vpop.f32.mrf.mxu1 }
  0xe6   : > { %v502_v14 = vadd.f32 %v456_v7, %v309_v6 }
  0xe7   : > { %v911_v10 = vadd.f32 %v4376_v56, %v860_v4  ;;  %3491 = vmatmul.msk.f32.gmra.mxu2 %vm216_vm0, %v4272_v31  ;;  %3441 = vmatmul.msk.f32.gmra.mxu0 %vm216_vm0, %v4244_v27 }
  0xe8   : > { %3524 = vmatmul.msk.f32.gmra.mxu3 %vm216_vm0, %v3507_v5  ;;  %3458 = vmatmul.msk.f32.gmra.mxu1 %vm216_vm0, %v3505_v46 }
  0xe9   : > { %v927_v11 = vmax.f32 %v911_v10, 0.0 }
  0xea   : > { %v636_v15 = vpop.f32.mrf.mxu2 }
  0xeb   : > { %v815_v36 = vpop.f32.mrf.mxu3  ;;  %943 = vst [vmem:[%s4389_s21 + $0x40] sm:$0xff] %v927_v11  ;;  %v682_v38 = vadd.f32 %v636_v15, %v502_v14  ;;  %v3777_v14 = vld [vmem:[%s4950_s1 + $0x68] sm:$0xff]  ;;  %v3810_v11 = vld [vmem:[%s4950_s1 + $0x78] sm:$0xff] }
  0xec   : > { %v312_v41 = vpop.f32.mrf.mxu0  ;;  %v3711_v15 = vld [vmem:[%s4950_s1 + $0x28] sm:$0xff]  ;;  %2857 = vmatpush.msrb.mxu2 %v3777_v14  ;;  %3036 = vmatpush.msrb.mxu3 %v3810_v11 }
  0xed   : > { %v861_v39 = vadd.f32 %v815_v36, %v682_v38  ;;  %v459_v42 = vpop.f32.mrf.mxu1  ;;  %v3511_v36 = vld [vmem:[%s4134_s24 + $0xb2] sm:$0xff]  ;;  %2531 = vmatpush.msrb.mxu0 %v3711_v15 }
  0xee   : > { %v503_v48 = vadd.f32 %v459_v42, %v312_v41  ;;  %v3744_v38 = vld [vmem:[%s4950_s1 + $0x38] sm:$0xff] }
  0xef   : > { %v912_v44 = vadd.f32 %v4376_v56, %v861_v39  ;;  %3492 = vmatmul.msk.f32.gmra.mxu2 %vm216_vm0, %v4286_v33  ;;  %3442 = vmatmul.msk.f32.gmra.mxu0 %vm216_vm0, %v4258_v29 }
  0xf0   : > { %3525 = vmatmul.msk.f32.gmra.mxu3 %vm216_vm0, %v3508_v40  ;;  %3459 = vmatmul.msk.f32.gmra.mxu1 %vm216_vm0, %v3506_v59 }
  0xf1   : > { %v928_v46 = vmax.f32 %v912_v44, 0.0  ;;  %2678 = vmatpush.msrb.mxu1 %v3744_v38 }
  0xf2   : > { %v639_v49 = vpop.f32.mrf.mxu2 }
  0xf3   : > { %v818_v50 = vpop.f32.mrf.mxu3  ;;  %944 = vst [vmem:[%s4389_s21 + $0x48] sm:$0xff] %v928_v46  ;;  %v683_v51 = vadd.f32 %v639_v49, %v503_v48 }
  0xf4   : > { %v315_v54 = vpop.f32.mrf.mxu0 }
  0xf5   : > { %v862_v52 = vadd.f32 %v818_v50, %v683_v51  ;;  %v462_v55 = vpop.f32.mrf.mxu1  ;;  %v3512_v51 = vld [vmem:[%s4134_s24 + $0xc2] sm:$0xff] }
  0xf6   : > { %v504_v57 = vadd.f32 %v462_v55, %v315_v54 }
  0xf7   : > { %v913_v58 = vadd.f32 %v4376_v56, %v862_v52  ;;  %3493 = vmatmul.msk.f32.gmra.mxu2 %vm216_vm0, %v4300_v35  ;;  %3443 = vmatmul.msk.f32.gmra.mxu0 %vm216_vm0, %v4272_v31 }
  0xf8   : > { %3526 = vmatmul.msk.f32.gmra.mxu3 %vm216_vm0, %v3509_v53  ;;  %3460 = vmatmul.msk.f32.gmra.mxu1 %vm216_vm0, %v3507_v5 }
  0xf9   : > { %v929_v59 = vmax.f32 %v913_v58, 0.0 }
  0xfa   : > { %v642_v60 = vpop.f32.mrf.mxu2 }
  0xfb   : > { %v821_v61 = vpop.f32.mrf.mxu3  ;;  %945 = vst [vmem:[%s4389_s21 + $0x50] sm:$0xff] %v929_v59  ;;  %v684_v62 = vadd.f32 %v642_v60, %v504_v57 }
  0xfc   : > { %v318_v1 = vpop.f32.mrf.mxu0 }
  0xfd   : > { %v863_v63 = vadd.f32 %v821_v61, %v684_v62  ;;  %v465_v2 = vpop.f32.mrf.mxu1  ;;  %v3513_v61 = vld [vmem:[%s4134_s24 + $0xca] sm:$0xff] }
  0xfe   : > { %v505_v4 = vadd.f32 %v465_v2, %v318_v1 }
  0xff   : > { %v914_v3 = vadd.f32 %v4376_v56, %v863_v63  ;;  %3494 = vmatmul.msk.f32.gmra.mxu2 %vm216_vm0, %v4312_v37  ;;  %3444 = vmatmul.msk.f32.gmra.mxu0 %vm216_vm0, %v4286_v33 }
 0x100   : > { %3527 = vmatmul.msk.f32.gmra.mxu3 %vm216_vm0, %v3510_v0  ;;  %3461 = vmatmul.msk.f32.gmra.mxu1 %vm216_vm0, %v3508_v40 }
 0x101   : > { %v930_v5 = vmax.f32 %v914_v3, 0.0 }
 0x102   : > { %v645_v6 = vpop.f32.mrf.mxu2 }
 0x103   : > { %v824_v7 = vpop.f32.mrf.mxu3  ;;  %946 = vst [vmem:[%s4389_s21 + $0x58] sm:$0xff] %v930_v5  ;;  %v685_v10 = vadd.f32 %v645_v6, %v505_v4 }
 0x104   : > { %v321_v39 = vpop.f32.mrf.mxu0 }
 0x105   : > { %v864_v40 = vadd.f32 %v824_v7, %v685_v10  ;;  %v468_v41 = vpop.f32.mrf.mxu1 }
 0x106   : > { %v506_v44 = vadd.f32 %v468_v41, %v321_v39 }
 0x107   : > { %v915_v42 = vadd.f32 %v4376_v56, %v864_v40  ;;  %3495 = vmatmul.msk.f32.gmra.mxu2 %vm216_vm0, %v4335_v43  ;;  %3445 = vmatmul.msk.f32.gmra.mxu0 %vm216_vm0, %v4300_v35 }
 0x108   : > { %3528 = vmatmul.msk.f32.gmra.mxu3 %vm216_vm0, %v3511_v36  ;;  %3462 = vmatmul.msk.f32.gmra.mxu1 %vm216_vm0, %v3509_v53 }
 0x109   : > { %v931_v48 = vmax.f32 %v915_v42, 0.0 }
 0x10a   : > { %v648_v46 = vpop.f32.mrf.mxu2 }
 0x10b   : > { %v827_v49 = vpop.f32.mrf.mxu3  ;;  %947 = vst [vmem:[%s4389_s21 + $0x60] sm:$0xff] %v931_v48  ;;  %v686_v50 = vadd.f32 %v648_v46, %v506_v44 }
 0x10c   : > { %v324_v54 = vpop.f32.mrf.mxu0 }
 0x10d   : > { %v865_v52 = vadd.f32 %v827_v49, %v686_v50  ;;  %v471_v55 = vpop.f32.mrf.mxu1 }
 0x10e   : > { %v507_v57 = vadd.f32 %v471_v55, %v324_v54 }
 0x10f   : > { %v916_v58 = vadd.f32 %v4376_v56, %v865_v52  ;;  %3496 = vmatmul.msk.f32.gmra.mxu2 %vm216_vm0, %v4346_v45  ;;  %3446 = vmatmul.msk.f32.gmra.mxu0 %vm216_vm0, %v4312_v37 }
 0x110   : > { %3529 = vmatmul.msk.f32.gmra.mxu3 %vm216_vm0, %v3512_v51  ;;  %3463 = vmatmul.msk.f32.gmra.mxu1 %vm216_vm0, %v3510_v0 }
 0x111   : > { %v932_v35 = vmax.f32 %v916_v58, 0.0 }
 0x112   : > { %v651_v53 = vpop.f32.mrf.mxu2 }
 0x113   : > { %v830_v59 = vpop.f32.mrf.mxu3  ;;  %948 = vst [vmem:[%s4389_s21 + $0x68] sm:$0xff] %v932_v35  ;;  %v687_v60 = vadd.f32 %v651_v53, %v507_v57 }
 0x114   : > { %v327_v63 = vpop.f32.mrf.mxu0 }
 0x115   : > { %v866_v62 = vadd.f32 %v830_v59, %v687_v60  ;;  %v474_v1 = vpop.f32.mrf.mxu1 }
 0x116   : > { %v508_v2 = vadd.f32 %v474_v1, %v327_v63 }
 0x117   : > { %v917_v45 = vadd.f32 %v4376_v56, %v866_v62  ;;  %3497 = vmatmul.msk.f32.gmra.mxu2 %vm216_vm0, %v4356_v47  ;;  %3447 = vmatmul.msk.f32.gmra.mxu0 %vm216_vm0, %v4335_v43 }
 0x118   : > { %3530 = vmatmul.msk.f32.gmra.mxu3 %vm216_vm0, %v3513_v61  ;;  %3464 = vmatmul.msk.f32.gmra.mxu1 %vm216_vm0, %v3511_v36 }
 0x119   : > { %v933_v37 = vmax.f32 %v917_v45, 0.0 }
 0x11a   : > { %v654_v0 = vpop.f32.mrf.mxu2 }
 0x11b   : > { %v833_v3 = vpop.f32.mrf.mxu3  ;;  %949 = vst [vmem:[%s4389_s21 + $0x70] sm:$0xff] %v933_v37  ;;  %v688_v4 = vadd.f32 %v654_v0, %v508_v2 }
 0x11c   : > { %v1034_v6 = vpop.f32.mrf.mxu0 }
 0x11d   : > { %v867_v5 = vadd.f32 %v833_v3, %v688_v4  ;;  %v1181_v7 = vpop.f32.mrf.mxu1 }
 0x11e   : > { %v1245_v47 = vadd.f32 %v1181_v7, %v1034_v6 }
 0x11f   : > { %v918_v10 = vadd.f32 %v4376_v56, %v867_v5  ;;  %3630 = vmatmul.msk.f32.vlgmr.msra.gmra.mxu2 %vm216_vm0, %v4171_v16  ;;  %3564 = vmatmul.msk.f32.vlgmr.msra.gmra.mxu0 %vm216_vm0, %v4137_v8 }
 0x120   : > { %3663 = vmatmul.msk.f32.vlgmr.msra.gmra.mxu3 %vm216_vm0, %v4174_v17  ;;  %3597 = vmatmul.msk.f32.vlgmr.msra.gmra.mxu1 %vm216_vm0, %v4140_v9 }
 0x121   : > { %v934_v43 = vmax.f32 %v918_v10, 0.0 }
 0x122   : > { %v1360_v14 = vpop.f32.mrf.mxu2 }
 0x123   : > { %v1539_v11 = vpop.f32.mrf.mxu3  ;;  %950 = vst [vmem:[%s4389_s21 + $0x78] sm:$0xff] %v934_v43  ;;  %v1424_v15 = vadd.f32 %v1360_v14, %v1245_v47 }
 0x124   : > { %v1037_v38 = vpop.f32.mrf.mxu0 }
 0x125   : > { %v1603_v36 = vadd.f32 %v1539_v11, %v1424_v15  ;;  %v1184_v40 = vpop.f32.mrf.mxu1 }
 0x126   : > { %v1246_v41 = vadd.f32 %v1184_v40, %v1037_v38 }
 0x127   : > { %v1651_v39 = vadd.f32 %v4376_v56, %v1603_v36  ;;  %3631 = vmatmul.msk.f32.gmra.mxu2 %vm216_vm0, %v4185_v18  ;;  %3565 = vmatmul.msk.f32.gmra.mxu0 %vm216_vm0, %v4154_v12 }
 0x128   : > { %3664 = vmatmul.msk.f32.gmra.mxu3 %vm216_vm0, %v4188_v19  ;;  %3598 = vmatmul.msk.f32.gmra.mxu1 %vm216_vm0, %v4157_v13 }
 0x129   : > { %v1667_v8 = vmax.f32 %v1651_v39, 0.0  ;;  %v4602_v39 = vld [vmem:[%s4134_s24 + $0x69] sm:$0xff] }
 0x12a   : > { %v1363_v9 = vpop.f32.mrf.mxu2 }
 0x12b   : > { %v1542_v42 = vpop.f32.mrf.mxu3  ;;  %3531 = vst [vmem:[%s4389_s21 + $0x80] sm:$0xff] %v1667_v8  ;;  %v1425_v44 = vadd.f32 %v1363_v9, %v1246_v41 }
 0x12c   : > { %v1040_v46 = vpop.f32.mrf.mxu0 }
 0x12d   : > { %v1604_v48 = vadd.f32 %v1542_v42, %v1425_v44  ;;  %v1187_v49 = vpop.f32.mrf.mxu1 }
 0x12e   : > { %v1247_v51 = vadd.f32 %v1187_v49, %v1040_v46  ;;  %v4615_v46 = vld [vmem:[%s4134_s24 + $0x79] sm:$0xff] }
 0x12f   : > { %v1652_v50 = vadd.f32 %v4376_v56, %v1604_v48  ;;  %3632 = vmatmul.msk.f32.gmra.mxu2 %vm216_vm0, %v4199_v20  ;;  %3566 = vmatmul.msk.f32.gmra.mxu0 %vm216_vm0, %v4171_v16 }
 0x130   : > { %3665 = vmatmul.msk.f32.gmra.mxu3 %vm216_vm0, %v4202_v21  ;;  %3599 = vmatmul.msk.f32.gmra.mxu1 %vm216_vm0, %v4174_v17 }
 0x131   : > { %v1668_v12 = vmax.f32 %v1652_v50, 0.0 }
 0x132   : > { %v1366_v13 = vpop.f32.mrf.mxu2 }
 0x133   : > { %v1545_v52 = vpop.f32.mrf.mxu3  ;;  %3532 = vst [vmem:[%s4389_s21 + $0x88] sm:$0xff] %v1668_v12  ;;  %v1426_v54 = vadd.f32 %v1366_v13, %v1247_v51 }
 0x134   : > { %v1043_v58 = vpop.f32.mrf.mxu0 }
 0x135   : > { %v1605_v55 = vadd.f32 %v1545_v52, %v1426_v54  ;;  %v1190_v57 = vpop.f32.mrf.mxu1  ;;  %v4627_v52 = vld [vmem:[%s4134_s24 + $0x99] sm:$0xff] }
 0x136   : > { %v1248_v53 = vadd.f32 %v1190_v57, %v1043_v58  ;;  %v3556_v58 = vld [vmem:[%s4134_s24 + $0x80] sm:$0xff] }
 0x137   : > { %v1653_v35 = vadd.f32 %v4376_v56, %v1605_v55  ;;  %3633 = vmatmul.msk.f32.gmra.mxu2 %vm216_vm0, %v4213_v22  ;;  %3567 = vmatmul.msk.f32.gmra.mxu0 %vm216_vm0, %v4185_v18 }
 0x138   : > { %3666 = vmatmul.msk.f32.gmra.mxu3 %vm216_vm0, %v4216_v23  ;;  %3600 = vmatmul.msk.f32.gmra.mxu1 %vm216_vm0, %v4188_v19 }
 0x139   : > { %v1669_v16 = vmax.f32 %v1653_v35, 0.0 }
 0x13a   : > { %v1369_v17 = vpop.f32.mrf.mxu2 }
 0x13b   : > { %v1548_v59 = vpop.f32.mrf.mxu3  ;;  %3533 = vst [vmem:[%s4389_s21 + $0x90] sm:$0xff] %v1669_v16  ;;  %v1427_v60 = vadd.f32 %v1369_v17, %v1248_v53 }
 0x13c   : > { %v1046_v62 = vpop.f32.mrf.mxu0 }
 0x13d   : > { %v1606_v61 = vadd.f32 %v1548_v59, %v1427_v60  ;;  %v1193_v63 = vpop.f32.mrf.mxu1  ;;  %v3623_v60 = vld [vmem:[%s4134_s24 + $0xa8] sm:$0xff] }
 0x13e   : > { %v1249_v45 = vadd.f32 %v1193_v63, %v1046_v62 }
 0x13f   : > { %v1654_v1 = vadd.f32 %v4376_v56, %v1606_v61  ;;  %3634 = vmatmul.msk.f32.gmra.mxu2 %vm216_vm0, %v4227_v24  ;;  %3568 = vmatmul.msk.f32.gmra.mxu0 %vm216_vm0, %v4199_v20  ;;  %v4644_v61 = vld [vmem:[%s4134_s24 + $0xa9] sm:$0xff] }
 0x140   : > { %3667 = vmatmul.msk.f32.gmra.mxu3 %vm216_vm0, %v4230_v25  ;;  %3601 = vmatmul.msk.f32.gmra.mxu1 %vm216_vm0, %v4202_v21 }
 0x141   : > { %v1670_v18 = vmax.f32 %v1654_v1, 0.0  ;;  %v3557_v1 = vld [vmem:[%s4134_s24 + $0x90] sm:$0xff] }
 0x142   : > { %v1372_v19 = vpop.f32.mrf.mxu2 }
 0x143   : > { %v1551_v2 = vpop.f32.mrf.mxu3  ;;  %3534 = vst [vmem:[%s4389_s21 + $0x98] sm:$0xff] %v1670_v18  ;;  %v1428_v37 = vadd.f32 %v1372_v19, %v1249_v45  ;;  %v4648_v45 = vld [vmem:[%s4134_s24 + $0x91] sm:$0xff] }
 0x144   : > { %v1049_v3 = vpop.f32.mrf.mxu0 }
 0x145   : > { %v1607_v0 = vadd.f32 %v1551_v2, %v1428_v37  ;;  %v1196_v4 = vpop.f32.mrf.mxu1 }
 0x146   : > { %v1250_v6 = vadd.f32 %v1196_v4, %v1049_v3  ;;  %v3624_v4 = vld [vmem:[%s4134_s24 + $0xb0] sm:$0xff] }
 0x147   : > { %v1655_v5 = vadd.f32 %v4376_v56, %v1607_v0  ;;  %3635 = vmatmul.msk.f32.gmra.mxu2 %vm216_vm0, %v4241_v26  ;;  %3569 = vmatmul.msk.f32.gmra.mxu0 %vm216_vm0, %v4213_v22 }
 0x148   : > { %3668 = vmatmul.msk.f32.gmra.mxu3 %vm216_vm0, %v4244_v27  ;;  %3602 = vmatmul.msk.f32.gmra.mxu1 %vm216_vm0, %v4216_v23 }
 0x149   : > { %v1671_v20 = vmax.f32 %v1655_v5, 0.0  ;;  %v4660_v5 = vld [vmem:[%s4134_s24 + $0xb1] sm:$0xff] }
 0x14a   : > { %v1375_v21 = vpop.f32.mrf.mxu2 }
 0x14b   : > { %v1554_v7 = vpop.f32.mrf.mxu3  ;;  %3535 = vst [vmem:[%s4389_s21 + $0xa0] sm:$0xff] %v1671_v20  ;;  %v1429_v10 = vadd.f32 %v1375_v21, %v1250_v6 }
 0x14c   : > { %v1052_v43 = vpop.f32.mrf.mxu0 }
 0x14d   : > { %v1608_v47 = vadd.f32 %v1554_v7, %v1429_v10  ;;  %v1199_v26 = vpop.f32.mrf.mxu1  ;;  %v3558_v7 = vld [vmem:[%s4134_s24 + $0x98] sm:$0xff] }
 0x14e   : > { %v1251_v22 = vadd.f32 %v1199_v26, %v1052_v43 }
 0x14f   : > { %v1656_v14 = vadd.f32 %v4376_v56, %v1608_v47  ;;  %3636 = vmatmul.msk.f32.gmra.mxu2 %vm216_vm0, %v4255_v28  ;;  %3570 = vmatmul.msk.f32.gmra.mxu0 %vm216_vm0, %v4227_v24  ;;  %v3554_v28 = vld [vmem:[%s4134_s24 + $0x68] sm:$0xff] }
 0x150   : > { %3669 = vmatmul.msk.f32.gmra.mxu3 %vm216_vm0, %v4258_v29  ;;  %3603 = vmatmul.msk.f32.gmra.mxu1 %vm216_vm0, %v4230_v25 }
 0x151   : > { %v1672_v23 = vmax.f32 %v1656_v14, 0.0 }
 0x152   : > { %v1378_v27 = vpop.f32.mrf.mxu2 }
 0x153   : > { %v1557_v11 = vpop.f32.mrf.mxu3  ;;  %3536 = vst [vmem:[%s4389_s21 + $0xa8] sm:$0xff] %v1672_v23  ;;  %v1430_v15 = vadd.f32 %v1378_v27, %v1251_v22  ;;  %v3625_v23 = vld [vmem:[%s4134_s24 + $0xc0] sm:$0xff] }
 0x154   : > { %v1055_v38 = vpop.f32.mrf.mxu0  ;;  %v4673_v27 = vld [vmem:[%s4134_s24 + $0xc1] sm:$0xff] }
 0x155   : > { %v1609_v36 = vadd.f32 %v1557_v11, %v1430_v15  ;;  %v1202_v40 = vpop.f32.mrf.mxu1 }
 0x156   : > { %v1252_v24 = vadd.f32 %v1202_v40, %v1055_v38 }
 0x157   : > { %v1657_v29 = vadd.f32 %v4376_v56, %v1609_v36  ;;  %3637 = vmatmul.msk.f32.gmra.mxu2 %vm216_vm0, %v4269_v30  ;;  %3571 = vmatmul.msk.f32.gmra.mxu0 %vm216_vm0, %v3554_v28  ;;  %v3555_v30 = vld [vmem:[%s4134_s24 + $0x78] sm:$0xff] }
 0x158   : > { %3670 = vmatmul.msk.f32.gmra.mxu3 %vm216_vm0, %v4272_v31  ;;  %3604 = vmatmul.msk.f32.gmra.mxu1 %vm216_vm0, %v4602_v39 }
 0x159   : > { %v1673_v25 = vmax.f32 %v1657_v29, 0.0 }
 0x15a   : > { %v1381_v41 = vpop.f32.mrf.mxu2 }
 0x15b   : > { %v1560_v8 = vpop.f32.mrf.mxu3  ;;  %3537 = vst [vmem:[%s4389_s21 + $0xb0] sm:$0xff] %v1673_v25  ;;  %v1431_v9 = vadd.f32 %v1381_v41, %v1252_v24  ;;  %v3626_v41 = vld [vmem:[%s4134_s24 + $0xc8] sm:$0xff] }
 0x15c   : > { %v1058_v44 = vpop.f32.mrf.mxu0 }
 0x15d   : > { %v1610_v42 = vadd.f32 %v1560_v8, %v1431_v9  ;;  %v1205_v48 = vpop.f32.mrf.mxu1  ;;  %v4685_v8 = vld [vmem:[%s4134_s24 + $0xc9] sm:$0xff] }
 0x15e   : > { %v1253_v49 = vadd.f32 %v1205_v48, %v1058_v44 }
 0x15f   : > { %v1658_v31 = vadd.f32 %v4376_v56, %v1610_v42  ;;  %3638 = vmatmul.msk.f32.gmra.mxu2 %vm216_vm0, %v4283_v32  ;;  %3572 = vmatmul.msk.f32.gmra.mxu0 %vm216_vm0, %v3555_v30 }
 0x160   : > { %3671 = vmatmul.msk.f32.gmra.mxu3 %vm216_vm0, %v4286_v33  ;;  %3605 = vmatmul.msk.f32.gmra.mxu1 %vm216_vm0, %v4615_v46  ;;  %v4631_v33 = vld [vmem:[%s4134_s24 + $0x81] sm:$0xff] }
 0x161   : > { %v1674_v50 = vmax.f32 %v1658_v31, 0.0 }
 0x162   : > { %v1384_v51 = vpop.f32.mrf.mxu2 }
 0x163   : > { %v1563_v12 = vpop.f32.mrf.mxu3  ;;  %3538 = vst [vmem:[%s4389_s21 + $0xb8] sm:$0xff] %v1674_v50  ;;  %v1432_v13 = vadd.f32 %v1384_v51, %v1253_v49 }
 0x164   : > { %v1061_v32 = vpop.f32.mrf.mxu0 }
 0x165   : > { %v1611_v54 = vadd.f32 %v1563_v12, %v1432_v13  ;;  %v1208_v55 = vpop.f32.mrf.mxu1  ;;  %v3627_v12 = vld [vmem:[%s4134_s24 + $0xd8] sm:$0xff] }
 0x166   : > { %v1254_v35 = vadd.f32 %v1208_v55, %v1061_v32  ;;  %v4697_v13 = vld [vmem:[%s4134_s24 + $0xd9] sm:$0xff] }
 0x167   : > { %v1659_v57 = vadd.f32 %v4376_v56, %v1611_v54  ;;  %3639 = vmatmul.msk.f32.gmra.mxu2 %vm216_vm0, %v4297_v34  ;;  %3573 = vmatmul.msk.f32.gmra.mxu0 %vm216_vm0, %v3556_v58 }
 0x168   : > { %3672 = vmatmul.msk.f32.gmra.mxu3 %vm216_vm0, %v4627_v52  ;;  %3606 = vmatmul.msk.f32.gmra.mxu1 %vm216_vm0, %v4631_v33 }
 0x169   : > { %v1675_v53 = vmax.f32 %v1659_v57, 0.0 }
 0x16a   : > { %v1387_v16 = vpop.f32.mrf.mxu2 }
 0x16b   : > { %v1566_v17 = vpop.f32.mrf.mxu3  ;;  %3539 = vst [vmem:[%s4389_s21 + $0xc0] sm:$0xff] %v1675_v53  ;;  %v1433_v59 = vadd.f32 %v1387_v16, %v1254_v35 }
 0x16c   : > { %v1064_v62 = vpop.f32.mrf.mxu0 }
 0x16d   : > { %v1612_v34 = vadd.f32 %v1566_v17, %v1433_v59  ;;  %v1211_v63 = vpop.f32.mrf.mxu1  ;;  %v3628_v59 = vld [vmem:[%s4134_s24 + $0xe0] sm:$0xff] }
 0x16e   : > { %v1255_v19 = vadd.f32 %v1211_v63, %v1064_v62 }
 0x16f   : > { %v1660_v18 = vadd.f32 %v4376_v56, %v1612_v34  ;;  %3640 = vmatmul.msk.f32.gmra.mxu2 %vm216_vm0, %v3623_v60  ;;  %3574 = vmatmul.msk.f32.gmra.mxu0 %vm216_vm0, %v3557_v1 }
 0x170   : > { %3673 = vmatmul.msk.f32.gmra.mxu3 %vm216_vm0, %v4644_v61  ;;  %3607 = vmatmul.msk.f32.gmra.mxu1 %vm216_vm0, %v4648_v45 }
 0x171   : > { %v1676_v2 = vmax.f32 %v1660_v18, 0.0 }
 0x172   : > { %v1390_v37 = vpop.f32.mrf.mxu2 }
 0x173   : > { %v1569_v0 = vpop.f32.mrf.mxu3  ;;  %3540 = vst [vmem:[%s4389_s21 + $0xc8] sm:$0xff] %v1676_v2  ;;  %v1434_v3 = vadd.f32 %v1390_v37, %v1255_v19 }
 0x174   : > { %v1067_v20 = vpop.f32.mrf.mxu0 }
 0x175   : > { %v1613_v6 = vadd.f32 %v1569_v0, %v1434_v3  ;;  %v1214_v21 = vpop.f32.mrf.mxu1  ;;  %v3761_v3 = vld [vmem:[%s4134_s24 + $0x31] sm:$0xff] }
 0x176   : > { %v1256_v47 = vadd.f32 %v1214_v21, %v1067_v20 }
 0x177   : > { %v1661_v10 = vadd.f32 %v4376_v56, %v1613_v6  ;;  %3641 = vmatmul.msk.f32.gmra.mxu2 %vm216_vm0, %v3624_v4  ;;  %3575 = vmatmul.msk.f32.gmra.mxu0 %vm216_vm0, %v3558_v7  ;;  %v3695_v7 = vld [vmem:[%s4134_s24 + $0x19] sm:$0xff] }
 0x178   : > { %3674 = vmatmul.msk.f32.gmra.mxu3 %vm216_vm0, %v4660_v5  ;;  %3608 = vmatmul.msk.f32.gmra.mxu1 %vm216_vm0, %v4627_v52 }
 0x179   : > { %v1677_v43 = vmax.f32 %v1661_v10, 0.0  ;;  %v3728_v10 = vld [vmem:[%s4134_s24 + $0x1a] sm:$0xff] }
 0x17a   : > { %v1393_v26 = vpop.f32.mrf.mxu2 }
 0x17b   : > { %v1572_v14 = vpop.f32.mrf.mxu3  ;;  %3541 = vst [vmem:[%s4389_s21 + $0xd0] sm:$0xff] %v1677_v43  ;;  %v1435_v22 = vadd.f32 %v1393_v26, %v1256_v47 }
 0x17c   : > { %v1070_v15 = vpop.f32.mrf.mxu0 }
 0x17d   : > { %v1614_v11 = vadd.f32 %v1572_v14, %v1435_v22  ;;  %v1217_v36 = vpop.f32.mrf.mxu1 }
 0x17e   : > { %v1257_v40 = vadd.f32 %v1217_v36, %v1070_v15  ;;  %v3795_v15 = vld [vmem:[%s4134_s24 + $0x3a] sm:$0xff] }
 0x17f   : > { %v1662_v38 = vadd.f32 %v4376_v56, %v1614_v11  ;;  %3642 = vmatmul.msk.f32.gmra.mxu2 %vm216_vm0, %v3625_v23  ;;  %3576 = vmatmul.msk.f32.gmra.mxu0 %vm216_vm0, %v3623_v60  ;;  %v4709_v60 = vld [vmem:[%s4134_s24 + $0xe1] sm:$0xff]  ;;  %v3762_v11 = vld [vmem:[%s4134_s24 + $0x39] sm:$0xff] }
 0x180   : > { %3675 = vmatmul.msk.f32.gmra.mxu3 %vm216_vm0, %v4673_v27  ;;  %3609 = vmatmul.msk.f32.gmra.mxu1 %vm216_vm0, %v4644_v61 }
 0x181   : > { %v1678_v28 = vmax.f32 %v1662_v38, 0.0 }
 0x182   : > { %v1396_v29 = vpop.f32.mrf.mxu2 }
 0x183   : > { %v1575_v24 = vpop.f32.mrf.mxu3  ;;  %3542 = vst [vmem:[%s4389_s21 + $0xd8] sm:$0xff] %v1678_v28  ;;  %v1436_v25 = vadd.f32 %v1396_v29, %v1257_v40  ;;  %v3696_v28 = vld [vmem:[%s4134_s24 + $0x21] sm:$0xff] }
 0x184   : > { %v1073_v42 = vpop.f32.mrf.mxu0  ;;  %v3729_v29 = vld [vmem:[%s4134_s24 + $0x22] sm:$0xff] }
 0x185   : > { %v1615_v9 = vadd.f32 %v1575_v24, %v1436_v25  ;;  %v1220_v44 = vpop.f32.mrf.mxu1 }
 0x186   : > { %v1258_v30 = vadd.f32 %v1220_v44, %v1073_v42 }
 0x187   : > { %v1663_v48 = vadd.f32 %v4376_v56, %v1615_v9  ;;  %3643 = vmatmul.msk.f32.gmra.mxu2 %vm216_vm0, %v3626_v41  ;;  %3577 = vmatmul.msk.f32.gmra.mxu0 %vm216_vm0, %v3624_v4  ;;  %v3794_v4 = vld [vmem:[%s4134_s24 + $0x32] sm:$0xff] }
 0x188   : > { %3676 = vmatmul.msk.f32.gmra.mxu3 %vm216_vm0, %v4685_v8  ;;  %3610 = vmatmul.msk.f32.gmra.mxu1 %vm216_vm0, %v4660_v5 }
 0x189   : > { %v1679_v31 = vmax.f32 %v1663_v48, 0.0  ;;  %v3763_v48 = vld [vmem:[%s4134_s24 + $0x49] sm:$0xff] }
 0x18a   : > { %v1399_v49 = vpop.f32.mrf.mxu2 }
 0x18b   : > { %v1578_v50 = vpop.f32.mrf.mxu3  ;;  %3543 = vst [vmem:[%s4389_s21 + $0xe0] sm:$0xff] %v1679_v31  ;;  %v1437_v51 = vadd.f32 %v1399_v49, %v1258_v30  ;;  %v3796_v30 = vld [vmem:[%s4134_s24 + $0x4a] sm:$0xff] }
 0x18c   : > { %v1076_v32 = vpop.f32.mrf.mxu0 }
 0x18d   : > { %v1616_v54 = vadd.f32 %v1578_v50, %v1437_v51  ;;  %v1223_v55 = vpop.f32.mrf.mxu1  ;;  %v4744_v50 = vld [vmem:[%s4951_s2] ss:$0 sm:$0xff] }
 0x18e   : > { %v1259_v57 = vadd.f32 %v1223_v55, %v1076_v32 }
 0x18f   : > { %v1664_v58 = vadd.f32 %v4376_v56, %v1616_v54  ;;  %3644 = vmatmul.msk.f32.gmra.mxu2 %vm216_vm0, %v3627_v12  ;;  %3578 = vmatmul.msk.f32.gmra.mxu0 %vm216_vm0, %v3625_v23 }
 0x190   : > { %3677 = vmatmul.msk.f32.gmra.mxu3 %vm216_vm0, %v4697_v13  ;;  %3611 = vmatmul.msk.f32.gmra.mxu1 %vm216_vm0, %v4673_v27 }
 0x191   : > { %v1680_v35 = vmax.f32 %v1664_v58, 0.0 }
 0x192   : > { %v1402_v53 = vpop.f32.mrf.mxu2 }
 0x193   : > { %v1581_v16 = vpop.f32.mrf.mxu3  ;;  %3544 = vst [vmem:[%s4389_s21 + $0xe8] sm:$0xff] %v1680_v35  ;;  %v1438_v17 = vadd.f32 %v1402_v53, %v1259_v57  ;;  %v3764_v57 = vld [vmem:[%s4134_s24 + $0x51] sm:$0xff] }
 0x194   : > { %v1079_v62 = vpop.f32.mrf.mxu0  ;;  %v3797_v35 = vld [vmem:[%s4134_s24 + $0x52] sm:$0xff] }
 0x195   : > { %v1617_v34 = vadd.f32 %v1581_v16, %v1438_v17  ;;  %v1226_v63 = vpop.f32.mrf.mxu1 }
 0x196   : > { %v1260_v18 = vadd.f32 %v1226_v63, %v1079_v62 }
 0x197   : > { %v1665_v1 = vadd.f32 %v4376_v56, %v1617_v34  ;;  %3645 = vmatmul.msk.f32.gmra.mxu2 %vm216_vm0, %v3628_v59  ;;  %3579 = vmatmul.msk.f32.gmra.mxu0 %vm216_vm0, %v3626_v41 }
 0x198   : > { %3678 = vmatmul.msk.f32.gmra.mxu3 %vm216_vm0, %v4709_v60  ;;  %3612 = vmatmul.msk.f32.gmra.mxu1 %vm216_vm0, %v4685_v8 }
 0x199   : > { %v1681_v19 = vmax.f32 %v1665_v1, 0.0 }
 0x19a   : > { %v1405_v2 = vpop.f32.mrf.mxu2 }
 0x19b   : > { %v1584_v37 = vpop.f32.mrf.mxu3  ;;  %3545 = vst [vmem:[%s4389_s21 + $0xf0] sm:$0xff] %v1681_v19  ;;  %v1439_v0 = vadd.f32 %v1405_v2, %v1260_v18  ;;  %v3765_v19 = vld [vmem:[%s4134_s24 + $0x61] sm:$0xff] }
 0x19c   : > { %v1783_v20 = vpop.f32.mrf.mxu0  ;;  %v3798_v2 = vld [vmem:[%s4134_s24 + $0x62] sm:$0xff] }
 0x19d   : > { %v1618_v6 = vadd.f32 %v1584_v37, %v1439_v0  ;;  %v1930_v21 = vpop.f32.mrf.mxu1 }
 0x19e   : > { %v1994_v43 = vadd.f32 %v1930_v21, %v1783_v20 }
 0x19f   : > { %v1666_v47 = vadd.f32 %v4376_v56, %v1618_v6  ;;  %3778 = vmatmul.msk.f32.vlgmr.msrb.gmra.mxu2 %vm216_vm0, %v3761_v3  ;;  %3712 = vmatmul.msk.f32.vlgmr.msrb.gmra.mxu0 %vm216_vm0, %v3695_v7 }
 0x1a0   : > { %3811 = vmatmul.msk.f32.vlgmr.msrb.gmra.mxu3 %vm216_vm0, %v3794_v4  ;;  %3745 = vmatmul.msk.f32.vlgmr.msrb.gmra.mxu1 %vm216_vm0, %v3728_v10 }
 0x1a1   : > { %v1682_v26 = vmax.f32 %v1666_v47, 0.0  ;;  %v3799_v47 = vld [vmem:[%s4134_s24 + $0x6a] sm:$0xff] }
 0x1a2   : > { %v2110_v14 = vpop.f32.mrf.mxu2 }
 0x1a3   : > { %v2289_v22 = vpop.f32.mrf.mxu3  ;;  %3546 = vst [vmem:[%s4389_s21 + $0xf8] sm:$0xff] %v1682_v26  ;;  %v2174_v23 = vadd.f32 %v2110_v14, %v1994_v43 }
 0x1a4   : > { %v1786_v38 = vpop.f32.mrf.mxu0 }
 0x1a5   : > { %v2353_v36 = vadd.f32 %v2289_v22, %v2174_v23  ;;  %v1933_v40 = vpop.f32.mrf.mxu1 }
 0x1a6   : > { %v1995_v25 = vadd.f32 %v1933_v40, %v1786_v38  ;;  %v3800_v40 = vld [vmem:[%s4134_s24 + $0x7a] sm:$0xff] }
 0x1a7   : > { %v2401_v24 = vadd.f32 %v4376_v56, %v2353_v36  ;;  %3779 = vmatmul.msk.f32.gmra.mxu2 %vm216_vm0, %v3762_v11  ;;  %3713 = vmatmul.msk.f32.gmra.mxu0 %vm216_vm0, %v3696_v28 }
 0x1a8   : > { %3812 = vmatmul.msk.f32.gmra.mxu3 %vm216_vm0, %v3795_v15  ;;  %3746 = vmatmul.msk.f32.gmra.mxu1 %vm216_vm0, %v3729_v29 }
 0x1a9   : > { %v2417_v41 = vmax.f32 %v2401_v24, 0.0 }
 0x1aa   : > { %v2113_v9 = vpop.f32.mrf.mxu2 }
 0x1ab   : > { %v2292_v42 = vpop.f32.mrf.mxu3  ;;  %3679 = vst [vmem:[%s4389_s21 + $0x100] sm:$0xff] %v2417_v41  ;;  %v2175_v44 = vadd.f32 %v2113_v9, %v1995_v25 }
 0x1ac   : > { %v1789_v56 = vpop.f32.mrf.mxu0 }
 0x1ad   : > { %v2354_v31 = vadd.f32 %v2292_v42, %v2175_v44  ;;  %v1936_v49 = vpop.f32.mrf.mxu1 }
 0x1ae   : > { %v1996_v12 = vadd.f32 %v1936_v49, %v1789_v56 }
 0x1af   : > { %v2402_v51 = vadd.f32 %v4744_v50, %v2354_v31  ;;  %3780 = vmatmul.msk.f32.gmra.mxu2 %vm216_vm0, %v3763_v48  ;;  %3714 = vmatmul.msk.f32.gmra.mxu0 %vm216_vm0, %v3761_v3 }
 0x1b0   : > { %3813 = vmatmul.msk.f32.gmra.mxu3 %vm216_vm0, %v3796_v30  ;;  %3747 = vmatmul.msk.f32.gmra.mxu1 %vm216_vm0, %v3794_v4 }
 0x1b1   : > { %v2418_v54 = vmax.f32 %v2402_v51, 0.0 }
 0x1b2   : > { %v2116_v32 = vpop.f32.mrf.mxu2 }
 0x1b3   : > { %v2295_v55 = vpop.f32.mrf.mxu3  ;;  %3680 = vst [vmem:[%s4389_s21 + $0x108] sm:$0xff] %v2418_v54  ;;  %v2176_v58 = vadd.f32 %v2116_v32, %v1996_v12 }
 0x1b4   : > { %v1792_v16 = vpop.f32.mrf.mxu0 }
 0x1b5   : > { %v2355_v53 = vadd.f32 %v2295_v55, %v2176_v58  ;;  %v1939_v17 = vpop.f32.mrf.mxu1 }
 0x1b6   : > { %v1997_v34 = vadd.f32 %v1939_v17, %v1792_v16 }
 0x1b7   : > { %v2403_v59 = vadd.f32 %v4744_v50, %v2355_v53  ;;  %3781 = vmatmul.msk.f32.gmra.mxu2 %vm216_vm0, %v3764_v57  ;;  %3715 = vmatmul.msk.f32.gmra.mxu0 %vm216_vm0, %v3762_v11 }
 0x1b8   : > { %3814 = vmatmul.msk.f32.gmra.mxu3 %vm216_vm0, %v3797_v35  ;;  %3748 = vmatmul.msk.f32.gmra.mxu1 %vm216_vm0, %v3795_v15 }
 0x1b9   : > { %v2419_v62 = vmax.f32 %v2403_v59, 0.0 }
 0x1ba   : > { %v2119_v63 = vpop.f32.mrf.mxu2 }
 0x1bb   : > { %v2298_v1 = vpop.f32.mrf.mxu3  ;;  %3681 = vst [vmem:[%s4389_s21 + $0x110] sm:$0xff] %v2419_v62  ;;  %v2177_v18 = vadd.f32 %v2119_v63, %v1997_v34 }
 0x1bc   : > { %v1795_v0 = vpop.f32.mrf.mxu0 }
 0x1bd   : > { %v2356_v37 = vadd.f32 %v2298_v1, %v2177_v18  ;;  %v1942_v3 = vpop.f32.mrf.mxu1  ;;  %v3803_v1 = vld [vmem:[%s4134_s24 + $0x9a] sm:$0xff] }
 0x1be   : > { %v1998_v6 = vadd.f32 %v1942_v3, %v1795_v0 }
 0x1bf   : > { %v2404_v4 = vadd.f32 %v4744_v50, %v2356_v37  ;;  %3782 = vmatmul.msk.f32.gmra.mxu2 %vm216_vm0, %v3765_v19  ;;  %3716 = vmatmul.msk.f32.gmra.mxu0 %vm216_vm0, %v3763_v48 }
 0x1c0   : > { %3815 = vmatmul.msk.f32.gmra.mxu3 %vm216_vm0, %v3798_v2  ;;  %3749 = vmatmul.msk.f32.gmra.mxu1 %vm216_vm0, %v3796_v30  ;;  %v3801_v30 = vld [vmem:[%s4134_s24 + $0x82] sm:$0xff] }
 0x1c1   : > { %v2420_v20 = vmax.f32 %v2404_v4, 0.0 }
 0x1c2   : > { %v2122_v21 = vpop.f32.mrf.mxu2 }
 0x1c3   : > { %v2301_v7 = vpop.f32.mrf.mxu3  ;;  %3682 = vst [vmem:[%s4389_s21 + $0x118] sm:$0xff] %v2420_v20  ;;  %v2178_v10 = vadd.f32 %v2122_v21, %v1998_v6  ;;  %v3804_v20 = vld [vmem:[%s4134_s24 + $0xaa] sm:$0xff] }
 0x1c4   : > { %v1798_v26 = vpop.f32.mrf.mxu0 }
 0x1c5   : > { %v2357_v43 = vadd.f32 %v2301_v7, %v2178_v10  ;;  %v1945_v14 = vpop.f32.mrf.mxu1 }
 0x1c6   : > { %v1999_v23 = vadd.f32 %v1945_v14, %v1798_v26 }
 0x1c7   : > { %v2405_v22 = vadd.f32 %v4744_v50, %v2357_v43  ;;  %3783 = vmatmul.msk.f32.gmra.mxu2 %vm216_vm0, %v4602_v39  ;;  %3717 = vmatmul.msk.f32.gmra.mxu0 %vm216_vm0, %v3764_v57  ;;  %v3802_v57 = vld [vmem:[%s4134_s24 + $0x92] sm:$0xff] }
 0x1c8   : > { %3816 = vmatmul.msk.f32.gmra.mxu3 %vm216_vm0, %v3799_v47  ;;  %3750 = vmatmul.msk.f32.gmra.mxu1 %vm216_vm0, %v3797_v35 }
 0x1c9   : > { %v2421_v11 = vmax.f32 %v2405_v22, 0.0 }
 0x1ca   : > { %v2125_v15 = vpop.f32.mrf.mxu2 }
 0x1cb   : > { %v2304_v36 = vpop.f32.mrf.mxu3  ;;  %3683 = vst [vmem:[%s4389_s21 + $0x120] sm:$0xff] %v2421_v11  ;;  %v2179_v38 = vadd.f32 %v2125_v15, %v1999_v23  ;;  %v3805_v23 = vld [vmem:[%s4134_s24 + $0xb2] sm:$0xff] }
 0x1cc   : > { %v1801_v29 = vpop.f32.mrf.mxu0 }
 0x1cd   : > { %v2358_v28 = vadd.f32 %v2304_v36, %v2179_v38  ;;  %v1948_v24 = vpop.f32.mrf.mxu1 }
 0x1ce   : > { %v2000_v41 = vadd.f32 %v1948_v24, %v1801_v29 }
 0x1cf   : > { %v2406_v25 = vadd.f32 %v4744_v50, %v2358_v28  ;;  %3784 = vmatmul.msk.f32.gmra.mxu2 %vm216_vm0, %v4615_v46  ;;  %3718 = vmatmul.msk.f32.gmra.mxu0 %vm216_vm0, %v3765_v19 }
 0x1d0   : > { %3817 = vmatmul.msk.f32.gmra.mxu3 %vm216_vm0, %v3800_v40  ;;  %3751 = vmatmul.msk.f32.gmra.mxu1 %vm216_vm0, %v3798_v2 }
 0x1d1   : > { %v2422_v9 = vmax.f32 %v2406_v25, 0.0  ;;  %v3806_v25 = vld [vmem:[%s4134_s24 + $0xc2] sm:$0xff] }
 0x1d2   : > { %v2128_v42 = vpop.f32.mrf.mxu2 }
 0x1d3   : > { %v2307_v44 = vpop.f32.mrf.mxu3  ;;  %3684 = vst [vmem:[%s4389_s21 + $0x128] sm:$0xff] %v2422_v9  ;;  %v2180_v48 = vadd.f32 %v2128_v42, %v2000_v41 }
 0x1d4   : > { %v1804_v56 = vpop.f32.mrf.mxu0 }
 0x1d5   : > { %v2359_v31 = vadd.f32 %v2307_v44, %v2180_v48  ;;  %v1951_v49 = vpop.f32.mrf.mxu1 }
 0x1d6   : > { %v2001_v12 = vadd.f32 %v1951_v49, %v1804_v56  ;;  %v3807_v49 = vld [vmem:[%s4134_s24 + $0xca] sm:$0xff] }
 0x1d7   : > { %v2407_v51 = vadd.f32 %v4744_v50, %v2359_v31  ;;  %3785 = vmatmul.msk.f32.gmra.mxu2 %vm216_vm0, %v4631_v33  ;;  %3719 = vmatmul.msk.f32.gmra.mxu0 %vm216_vm0, %v4602_v39 }
 0x1d8   : > { %3818 = vmatmul.msk.f32.gmra.mxu3 %vm216_vm0, %v3801_v30  ;;  %3752 = vmatmul.msk.f32.gmra.mxu1 %vm216_vm0, %v3799_v47 }
 0x1d9   : > { %v2423_v54 = vmax.f32 %v2407_v51, 0.0 }
 0x1da   : > { %v2131_v32 = vpop.f32.mrf.mxu2 }
 0x1db   : > { %v2310_v55 = vpop.f32.mrf.mxu3  ;;  %3685 = vst [vmem:[%s4389_s21 + $0x130] sm:$0xff] %v2423_v54  ;;  %v2181_v58 = vadd.f32 %v2131_v32, %v2001_v12 }
 0x1dc   : > { %v1807_v53 = vpop.f32.mrf.mxu0 }
 0x1dd   : > { %v2360_v35 = vadd.f32 %v2310_v55, %v2181_v58  ;;  %v1954_v16 = vpop.f32.mrf.mxu1 }
 0x1de   : > { %v2002_v59 = vadd.f32 %v1954_v16, %v1807_v53  ;;  %v3808_v53 = vld [vmem:[%s4134_s24 + $0xda] sm:$0xff] }
 0x1df   : > { %v2408_v17 = vadd.f32 %v4744_v50, %v2360_v35  ;;  %3786 = vmatmul.msk.f32.gmra.mxu2 %vm216_vm0, %v4648_v45  ;;  %3720 = vmatmul.msk.f32.gmra.mxu0 %vm216_vm0, %v4615_v46 }
 0x1e0   : > { %3819 = vmatmul.msk.f32.gmra.mxu3 %vm216_vm0, %v3802_v57  ;;  %3753 = vmatmul.msk.f32.gmra.mxu1 %vm216_vm0, %v3800_v40 }
 0x1e1   : > { %v2424_v39 = vmax.f32 %v2408_v17, 0.0 }
 0x1e2   : > { %v2134_v34 = vpop.f32.mrf.mxu2 }
 0x1e3   : > { %v2313_v62 = vpop.f32.mrf.mxu3  ;;  %3686 = vst [vmem:[%s4389_s21 + $0x138] sm:$0xff] %v2424_v39  ;;  %v2182_v63 = vadd.f32 %v2134_v34, %v2002_v59 }
 0x1e4   : > { %v1810_v19 = vpop.f32.mrf.mxu0 }
 0x1e5   : > { %v2361_v18 = vadd.f32 %v2313_v62, %v2182_v63  ;;  %v1957_v2 = vpop.f32.mrf.mxu1 }
 0x1e6   : > { %v2003_v0 = vadd.f32 %v1957_v2, %v1810_v19 }
 0x1e7   : > { %v2409_v37 = vadd.f32 %v4744_v50, %v2361_v18  ;;  %3787 = vmatmul.msk.f32.gmra.mxu2 %vm216_vm0, %v4627_v52  ;;  %3721 = vmatmul.msk.f32.gmra.mxu0 %vm216_vm0, %v4631_v33  ;;  %v3809_v18 = vld [vmem:[%s4134_s24 + $0xe2] sm:$0xff]  ;;  %s3200_s24 = scalar_lea.sflag [#allocation4], %s185_s9 }
 0x1e8   : > { %3820 = vmatmul.msk.f32.gmra.mxu3 %vm216_vm0, %v3803_v1  ;;  %3754 = vmatmul.msk.f32.gmra.mxu1 %vm216_vm0, %v3801_v30 }
 0x1e9   : > { %v2425_v46 = vmax.f32 %v2409_v37, 0.0 }
 0x1ea   : > { %v2137_v3 = vpop.f32.mrf.mxu2 }
 0x1eb   : > { %v2316_v4 = vpop.f32.mrf.mxu3  ;;  %3687 = vst [vmem:[%s4389_s21 + $0x140] sm:$0xff] %v2425_v46  ;;  %v2183_v6 = vadd.f32 %v2137_v3, %v2003_v0 }
 0x1ec   : > { %v1813_v7 = vpop.f32.mrf.mxu0 }
 0x1ed   : > { %v2362_v21 = vadd.f32 %v2316_v4, %v2183_v6  ;;  %v1960_v10 = vpop.f32.mrf.mxu1 }
 0x1ee   : > { %v2004_v43 = vadd.f32 %v1960_v10, %v1813_v7 }
 0x1ef   : > { %v2410_v47 = vadd.f32 %v4744_v50, %v2362_v21  ;;  %3788 = vmatmul.msk.f32.gmra.mxu2 %vm216_vm0, %v4644_v61  ;;  %3722 = vmatmul.msk.f32.gmra.mxu0 %vm216_vm0, %v4648_v45 }
 0x1f0   : > { %3821 = vmatmul.msk.f32.gmra.mxu3 %vm216_vm0, %v3804_v20  ;;  %3755 = vmatmul.msk.f32.gmra.mxu1 %vm216_vm0, %v3802_v57 }
 0x1f1   : > { %v2426_v33 = vmax.f32 %v2410_v47, 0.0 }
 0x1f2   : > { %v2140_v26 = vpop.f32.mrf.mxu2 }
 0x1f3   : > { %v2319_v14 = vpop.f32.mrf.mxu3  ;;  %3688 = vst [vmem:[%s4389_s21 + $0x148] sm:$0xff] %v2426_v33  ;;  %v2184_v22 = vadd.f32 %v2140_v26, %v2004_v43 }
 0x1f4   : > { %v1816_v15 = vpop.f32.mrf.mxu0 }
 0x1f5   : > { %v2363_v11 = vadd.f32 %v2319_v14, %v2184_v22  ;;  %v1963_v36 = vpop.f32.mrf.mxu1 }
 0x1f6   : > { %v2005_v40 = vadd.f32 %v1963_v36, %v1816_v15 }
 0x1f7   : > { %v2411_v38 = vadd.f32 %v4744_v50, %v2363_v11  ;;  %3789 = vmatmul.msk.f32.gmra.mxu2 %vm216_vm0, %v4660_v5  ;;  %3723 = vmatmul.msk.f32.gmra.mxu0 %vm216_vm0, %v4627_v52 }
 0x1f8   : > { %3822 = vmatmul.msk.f32.gmra.mxu3 %vm216_vm0, %v3805_v23  ;;  %3756 = vmatmul.msk.f32.gmra.mxu1 %vm216_vm0, %v3803_v1 }
 0x1f9   : > { %v2427_v45 = vmax.f32 %v2411_v38, 0.0 }
 0x1fa   : > { %v2143_v28 = vpop.f32.mrf.mxu2 }
 0x1fb   : > { %v2322_v29 = vpop.f32.mrf.mxu3  ;;  %3689 = vst [vmem:[%s4389_s21 + $0x150] sm:$0xff] %v2427_v45  ;;  %v2185_v24 = vadd.f32 %v2143_v28, %v2005_v40 }
 0x1fc   : > { %v1819_v9 = vpop.f32.mrf.mxu0 }
 0x1fd   : > { %v2364_v41 = vadd.f32 %v2322_v29, %v2185_v24  ;;  %v1966_v42 = vpop.f32.mrf.mxu1 }
 0x1fe   : > { %v2006_v48 = vadd.f32 %v1966_v42, %v1819_v9 }
 0x1ff   : > { %v2412_v44 = vadd.f32 %v4744_v50, %v2364_v41  ;;  %3790 = vmatmul.msk.f32.gmra.mxu2 %vm216_vm0, %v4673_v27  ;;  %3724 = vmatmul.msk.f32.gmra.mxu0 %vm216_vm0, %v4644_v61 }
 0x200   : > { %3823 = vmatmul.msk.f32.gmra.mxu3 %vm216_vm0, %v3806_v25  ;;  %3757 = vmatmul.msk.f32.gmra.mxu1 %vm216_vm0, %v3804_v20 }
 0x201   : > { %v2428_v52 = vmax.f32 %v2412_v44, 0.0 }
 0x202   : > { %v2146_v30 = vpop.f32.mrf.mxu2 }
 0x203   : > { %v2325_v31 = vpop.f32.mrf.mxu3  ;;  %3690 = vst [vmem:[%s4389_s21 + $0x158] sm:$0xff] %v2428_v52  ;;  %v2186_v56 = vadd.f32 %v2146_v30, %v2006_v48 }
 0x204   : > { %v1822_v12 = vpop.f32.mrf.mxu0 }
 0x205   : > { %v2365_v51 = vadd.f32 %v2325_v31, %v2186_v56  ;;  %v1969_v54 = vpop.f32.mrf.mxu1 }
 0x206   : > { %v2007_v55 = vadd.f32 %v1969_v54, %v1822_v12 }
 0x207   : > { %v2413_v32 = vadd.f32 %v4744_v50, %v2365_v51  ;;  %3791 = vmatmul.msk.f32.gmra.mxu2 %vm216_vm0, %v4685_v8  ;;  %3725 = vmatmul.msk.f32.gmra.mxu0 %vm216_vm0, %v4660_v5 }
 0x208   : > { %3824 = vmatmul.msk.f32.gmra.mxu3 %vm216_vm0, %v3807_v49  ;;  %3758 = vmatmul.msk.f32.gmra.mxu1 %vm216_vm0, %v3805_v23 }
 0x209   : > { %v2429_v61 = vmax.f32 %v2413_v32, 0.0 }
 0x20a   : > { %v2149_v58 = vpop.f32.mrf.mxu2 }
 0x20b   : > { %v2328_v57 = vpop.f32.mrf.mxu3  ;;  %3691 = vst [vmem:[%s4389_s21 + $0x160] sm:$0xff] %v2429_v61  ;;  %v2187_v35 = vadd.f32 %v2149_v58, %v2007_v55 }
 0x20c   : > { %v1825_v17 = vpop.f32.mrf.mxu0 }
 0x20d   : > { %v2366_v16 = vadd.f32 %v2328_v57, %v2187_v35  ;;  %v1972_v59 = vpop.f32.mrf.mxu1 }
 0x20e   : > { %v2008_v34 = vadd.f32 %v1972_v59, %v1825_v17 }
 0x20f   : > { %v2414_v39 = vadd.f32 %v4744_v50, %v2366_v16  ;;  %3792 = vmatmul.msk.f32.gmra.mxu2 %vm216_vm0, %v4697_v13  ;;  %3726 = vmatmul.msk.f32.gmra.mxu0 %vm216_vm0, %v4673_v27 }
 0x210   : > { %3825 = vmatmul.msk.f32.gmra.mxu3 %vm216_vm0, %v3808_v53  ;;  %3759 = vmatmul.msk.f32.gmra.mxu1 %vm216_vm0, %v3806_v25 }
 0x211   : > { %v2430_v5 = vmax.f32 %v2414_v39, 0.0 }
 0x212   : > { %v2152_v62 = vpop.f32.mrf.mxu2 }
 0x213   : > { %v2331_v63 = vpop.f32.mrf.mxu3  ;;  %3692 = vst [vmem:[%s4389_s21 + $0x168] sm:$0xff] %v2430_v5  ;;  %v2188_v1 = vadd.f32 %v2152_v62, %v2008_v34 }
 0x214   : > { %v1828_v2 = vpop.f32.mrf.mxu0 }
 0x215   : > { %v2367_v19 = vadd.f32 %v2331_v63, %v2188_v1  ;;  %v1975_v37 = vpop.f32.mrf.mxu1 }
 0x216   : > { %v2009_v0 = vadd.f32 %v1975_v37, %v1828_v2 }
 0x217   : > { %v2415_v13 = vadd.f32 %v4744_v50, %v2367_v19  ;;  %3793 = vmatmul.msk.f32.gmra.mxu2 %vm216_vm0, %v4709_v60  ;;  %3727 = vmatmul.msk.f32.gmra.mxu0 %vm216_vm0, %v4685_v8 }
 0x218   : > { %3826 = vmatmul.msk.f32.gmra.mxu3 %vm216_vm0, %v3809_v18  ;;  %3760 = vmatmul.msk.f32.gmra.mxu1 %vm216_vm0, %v3807_v49 }
 0x219   : > { %v2431_v27 = vmax.f32 %v2415_v13, 0.0 }
 0x21a   : > { %v2155_v46 = vpop.f32.mrf.mxu2 }
 0x21b   : > { %v2334_v3 = vpop.f32.mrf.mxu3  ;;  %3693 = vst [vmem:[%s4389_s21 + $0x170] sm:$0xff] %v2431_v27  ;;  %v2189_v4 = vadd.f32 %v2155_v46, %v2009_v0 }
 0x21c   : > { %v2533_v20 = vpop.f32.mrf.mxu0 }
 0x21d   : > { %v2368_v6 = vadd.f32 %v2334_v3, %v2189_v4  ;;  %v2680_v21 = vpop.f32.mrf.mxu1 }
 0x21e   : > { %v2744_v7 = vadd.f32 %v2680_v21, %v2533_v20 }
 0x21f   : > { %v2416_v60 = vadd.f32 %v4744_v50, %v2368_v6 }
 0x221   : > { %v2432_v10 = vmax.f32 %v2416_v60, 0.0 }
 0x222   : > { %v2859_v47 = vpop.f32.mrf.mxu2 }
 0x223   : > { %v3038_v43 = vpop.f32.mrf.mxu3  ;;  %3694 = vst [vmem:[%s4389_s21 + $0x178] sm:$0xff] %v2432_v10  ;;  %v2923_v33 = vadd.f32 %v2859_v47, %v2744_v7 }
 0x224   : > { %v2536_v26 = vpop.f32.mrf.mxu0 }
 0x225   : > { %v3102_v8 = vadd.f32 %v3038_v43, %v2923_v33  ;;  %v2683_v14 = vpop.f32.mrf.mxu1 }
 0x226   : > { %v2745_v23 = vadd.f32 %v2683_v14, %v2536_v26 }
 0x227   : > { %v3150_v22 = vadd.f32 %v4744_v50, %v3102_v8 }
 0x229   : > { %v3166_v11 = vmax.f32 %v3150_v22, 0.0 }
 0x22a   : > { %v2862_v15 = vpop.f32.mrf.mxu2 }
 0x22b   : > { %v3041_v36 = vpop.f32.mrf.mxu3  ;;  %3827 = vst [vmem:[%s4389_s21 + $0x180] sm:$0xff] %v3166_v11  ;;  %v2924_v38 = vadd.f32 %v2862_v15, %v2745_v23 }
 0x22c   : > { %v2539_v45 = vpop.f32.mrf.mxu0 }
 0x22d   : > { %v3103_v40 = vadd.f32 %v3041_v36, %v2924_v38  ;;  %v2686_v28 = vpop.f32.mrf.mxu1 }
 0x22e   : > { %v2746_v24 = vadd.f32 %v2686_v28, %v2539_v45 }
 0x22f   : > { %v3151_v29 = vadd.f32 %v4744_v50, %v3103_v40 }
 0x231   : > { %v3167_v25 = vmax.f32 %v3151_v29, 0.0 }
 0x232   : > { %v2865_v41 = vpop.f32.mrf.mxu2 }
 0x233   : > { %v3044_v9 = vpop.f32.mrf.mxu3  ;;  %3828 = vst [vmem:[%s4389_s21 + $0x188] sm:$0xff] %v3167_v25  ;;  %v2925_v42 = vadd.f32 %v2865_v41, %v2746_v24 }
 0x234   : > { %v2542_v48 = vpop.f32.mrf.mxu0 }
 0x235   : > { %v3104_v44 = vadd.f32 %v3044_v9, %v2925_v42  ;;  %v2689_v52 = vpop.f32.mrf.mxu1 }
 0x236   : > { %v2747_v31 = vadd.f32 %v2689_v52, %v2542_v48 }
 0x237   : > { %v3152_v30 = vadd.f32 %v4744_v50, %v3104_v44 }
 0x239   : > { %v3168_v56 = vmax.f32 %v3152_v30, 0.0 }
 0x23a   : > { %v2868_v49 = vpop.f32.mrf.mxu2 }
 0x23b   : > { %v3047_v51 = vpop.f32.mrf.mxu3  ;;  %3829 = vst [vmem:[%s4389_s21 + $0x190] sm:$0xff] %v3168_v56  ;;  %v2926_v12 = vadd.f32 %v2868_v49, %v2747_v31 }
 0x23c   : > { %v2545_v32 = vpop.f32.mrf.mxu0 }
 0x23d   : > { %v3105_v54 = vadd.f32 %v3047_v51, %v2926_v12  ;;  %v2692_v55 = vpop.f32.mrf.mxu1 }
 0x23e   : > { %v2748_v58 = vadd.f32 %v2692_v55, %v2545_v32 }
 0x23f   : > { %v3153_v61 = vadd.f32 %v4744_v50, %v3105_v54 }
 0x241   : > { %v3169_v57 = vmax.f32 %v3153_v61, 0.0 }
 0x242   : > { %v2871_v35 = vpop.f32.mrf.mxu2 }
 0x243   : > { %v3050_v53 = vpop.f32.mrf.mxu3  ;;  %3830 = vst [vmem:[%s4389_s21 + $0x198] sm:$0xff] %v3169_v57  ;;  %v2927_v16 = vadd.f32 %v2871_v35, %v2748_v58 }
 0x244   : > { %v2548_v59 = vpop.f32.mrf.mxu0 }
 0x245   : > { %v3106_v17 = vadd.f32 %v3050_v53, %v2927_v16  ;;  %v2695_v39 = vpop.f32.mrf.mxu1 }
 0x246   : > { %v2749_v5 = vadd.f32 %v2695_v39, %v2548_v59 }
 0x247   : > { %v3154_v34 = vadd.f32 %v4744_v50, %v3106_v17 }
 0x249   : > { %v3170_v62 = vmax.f32 %v3154_v34, 0.0 }
 0x24a   : > { %v2874_v63 = vpop.f32.mrf.mxu2 }
 0x24b   : > { %v3053_v1 = vpop.f32.mrf.mxu3  ;;  %3831 = vst [vmem:[%s4389_s21 + $0x1a0] sm:$0xff] %v3170_v62  ;;  %v2928_v18 = vadd.f32 %v2874_v63, %v2749_v5 }
 0x24c   : > { %v2551_v2 = vpop.f32.mrf.mxu0 }
 0x24d   : > { %v3107_v19 = vadd.f32 %v3053_v1, %v2928_v18  ;;  %v2698_v37 = vpop.f32.mrf.mxu1 }
 0x24e   : > { %v2750_v0 = vadd.f32 %v2698_v37, %v2551_v2 }
 0x24f   : > { %v3155_v13 = vadd.f32 %v4744_v50, %v3107_v19 }
 0x251   : > { %v3171_v27 = vmax.f32 %v3155_v13, 0.0 }
 0x252   : > { %v2877_v46 = vpop.f32.mrf.mxu2 }
 0x253   : > { %v3056_v3 = vpop.f32.mrf.mxu3  ;;  %3832 = vst [vmem:[%s4389_s21 + $0x1a8] sm:$0xff] %v3171_v27  ;;  %v2929_v4 = vadd.f32 %v2877_v46, %v2750_v0 }
 0x254   : > { %v2554_v20 = vpop.f32.mrf.mxu0 }
 0x255   : > { %v3108_v6 = vadd.f32 %v3056_v3, %v2929_v4  ;;  %v2701_v21 = vpop.f32.mrf.mxu1 }
 0x256   : > { %v2751_v7 = vadd.f32 %v2701_v21, %v2554_v20 }
 0x257   : > { %v3156_v60 = vadd.f32 %v4744_v50, %v3108_v6 }
 0x259   : > { %v3172_v10 = vmax.f32 %v3156_v60, 0.0 }
 0x25a   : > { %v2880_v47 = vpop.f32.mrf.mxu2 }
 0x25b   : > { %v3059_v43 = vpop.f32.mrf.mxu3  ;;  %3833 = vst [vmem:[%s4389_s21 + $0x1b0] sm:$0xff] %v3172_v10  ;;  %v2930_v33 = vadd.f32 %v2880_v47, %v2751_v7 }
 0x25c   : > { %v2557_v26 = vpop.f32.mrf.mxu0 }
 0x25d   : > { %v3109_v8 = vadd.f32 %v3059_v43, %v2930_v33  ;;  %v2704_v14 = vpop.f32.mrf.mxu1 }
 0x25e   : > { %v2752_v23 = vadd.f32 %v2704_v14, %v2557_v26 }
 0x25f   : > { %v3157_v22 = vadd.f32 %v4744_v50, %v3109_v8 }
 0x261   : > { %v3173_v11 = vmax.f32 %v3157_v22, 0.0 }
 0x262   : > { %v2883_v15 = vpop.f32.mrf.mxu2 }
 0x263   : > { %v3062_v36 = vpop.f32.mrf.mxu3  ;;  %3834 = vst [vmem:[%s4389_s21 + $0x1b8] sm:$0xff] %v3173_v11  ;;  %v2931_v38 = vadd.f32 %v2883_v15, %v2752_v23 }
 0x264   : > { %v2560_v45 = vpop.f32.mrf.mxu0 }
 0x265   : > { %v3110_v40 = vadd.f32 %v3062_v36, %v2931_v38  ;;  %v2707_v28 = vpop.f32.mrf.mxu1 }
 0x266   : > { %v2753_v24 = vadd.f32 %v2707_v28, %v2560_v45 }
 0x267   : > { %v3158_v29 = vadd.f32 %v4744_v50, %v3110_v40 }
 0x269   : > { %v3174_v25 = vmax.f32 %v3158_v29, 0.0 }
 0x26a   : > { %v2886_v41 = vpop.f32.mrf.mxu2 }
 0x26b   : > { %v3065_v9 = vpop.f32.mrf.mxu3  ;;  %3835 = vst [vmem:[%s4389_s21 + $0x1c0] sm:$0xff] %v3174_v25  ;;  %v2932_v42 = vadd.f32 %v2886_v41, %v2753_v24 }
 0x26c   : > { %v2563_v48 = vpop.f32.mrf.mxu0 }
 0x26d   : > { %v3111_v44 = vadd.f32 %v3065_v9, %v2932_v42  ;;  %v2710_v52 = vpop.f32.mrf.mxu1 }
 0x26e   : > { %v2754_v31 = vadd.f32 %v2710_v52, %v2563_v48 }
 0x26f   : > { %v3159_v30 = vadd.f32 %v4744_v50, %v3111_v44 }
 0x271   : > { %v3175_v56 = vmax.f32 %v3159_v30, 0.0 }
 0x272   : > { %v2889_v49 = vpop.f32.mrf.mxu2 }
 0x273   : > { %v3068_v51 = vpop.f32.mrf.mxu3  ;;  %3836 = vst [vmem:[%s4389_s21 + $0x1c8] sm:$0xff] %v3175_v56  ;;  %v2933_v12 = vadd.f32 %v2889_v49, %v2754_v31 }
 0x274   : > { %v2566_v32 = vpop.f32.mrf.mxu0 }
 0x275   : > { %v3112_v54 = vadd.f32 %v3068_v51, %v2933_v12  ;;  %v2713_v55 = vpop.f32.mrf.mxu1 }
 0x276   : > { %v2755_v58 = vadd.f32 %v2713_v55, %v2566_v32 }
 0x277   : > { %v3160_v61 = vadd.f32 %v4744_v50, %v3112_v54 }
 0x279   : > { %v3176_v57 = vmax.f32 %v3160_v61, 0.0 }
 0x27a   : > { %v2892_v35 = vpop.f32.mrf.mxu2 }
 0x27b   : > { %v3071_v53 = vpop.f32.mrf.mxu3  ;;  %3837 = vst [vmem:[%s4389_s21 + $0x1d0] sm:$0xff] %v3176_v57  ;;  %v2934_v16 = vadd.f32 %v2892_v35, %v2755_v58 }
 0x27c   : > { %v2569_v59 = vpop.f32.mrf.mxu0 }
 0x27d   : > { %v3113_v17 = vadd.f32 %v3071_v53, %v2934_v16  ;;  %v2716_v39 = vpop.f32.mrf.mxu1 }
 0x27e   : > { %v2756_v5 = vadd.f32 %v2716_v39, %v2569_v59 }
 0x27f   : > { %v3161_v34 = vadd.f32 %v4744_v50, %v3113_v17 }
 0x281   : > { %v3177_v62 = vmax.f32 %v3161_v34, 0.0 }
 0x282   : > { %v2895_v63 = vpop.f32.mrf.mxu2 }
 0x283   : > { %v3074_v1 = vpop.f32.mrf.mxu3  ;;  %3838 = vst [vmem:[%s4389_s21 + $0x1d8] sm:$0xff] %v3177_v62  ;;  %v2935_v18 = vadd.f32 %v2895_v63, %v2756_v5 }
 0x284   : > { %v2572_v2 = vpop.f32.mrf.mxu0 }
 0x285   : > { %v3114_v19 = vadd.f32 %v3074_v1, %v2935_v18  ;;  %v2719_v37 = vpop.f32.mrf.mxu1 }
 0x286   : > { %v2757_v0 = vadd.f32 %v2719_v37, %v2572_v2 }
 0x287   : > { %v3162_v13 = vadd.f32 %v4744_v50, %v3114_v19 }
 0x289   : > { %v3178_v27 = vmax.f32 %v3162_v13, 0.0 }
 0x28a   : > { %v2898_v46 = vpop.f32.mrf.mxu2 }
 0x28b   : > { %v3077_v3 = vpop.f32.mrf.mxu3  ;;  %3839 = vst [vmem:[%s4389_s21 + $0x1e0] sm:$0xff] %v3178_v27  ;;  %v2936_v4 = vadd.f32 %v2898_v46, %v2757_v0 }
 0x28c   : > { %v2575_v20 = vpop.f32.mrf.mxu0 }
 0x28d   : > { %v3115_v6 = vadd.f32 %v3077_v3, %v2936_v4  ;;  %v2722_v21 = vpop.f32.mrf.mxu1 }
 0x28e   : > { %v2758_v7 = vadd.f32 %v2722_v21, %v2575_v20 }
 0x28f   : > { %v3163_v60 = vadd.f32 %v4744_v50, %v3115_v6 }
 0x291   : > { %v3179_v10 = vmax.f32 %v3163_v60, 0.0 }
 0x292   : > { %v2901_v47 = vpop.f32.mrf.mxu2 }
 0x293   : > { %v3080_v43 = vpop.f32.mrf.mxu3  ;;  %3840 = vst [vmem:[%s4389_s21 + $0x1e8] sm:$0xff] %v3179_v10  ;;  %v2937_v33 = vadd.f32 %v2901_v47, %v2758_v7 }
 0x294   : > { %v2578_v26 = vpop.f32.mrf.mxu0 }
 0x295   : > { %v3116_v8 = vadd.f32 %v3080_v43, %v2937_v33  ;;  %v2725_v14 = vpop.f32.mrf.mxu1 }
 0x296   : > { %v2759_v23 = vadd.f32 %v2725_v14, %v2578_v26 }
 0x297   : > { %v3164_v22 = vadd.f32 %v4744_v50, %v3116_v8 }
 0x299   : > { %v3180_v11 = vmax.f32 %v3164_v22, 0.0 }
 0x29a   : > { %v2904_v15 = vpop.f32.mrf.mxu2 }
 0x29b   : > { %v3083_v36 = vpop.f32.mrf.mxu3  ;;  %3841 = vst [vmem:[%s4389_s21 + $0x1f0] sm:$0xff] %v3180_v11  ;;  %v2938_v38 = vadd.f32 %v2904_v15, %v2759_v23 }
 0x29d   : > { %v3117_v40 = vadd.f32 %v3083_v36, %v2938_v38 }
 0x29f   : > { %v3165_v45 = vadd.f32 %v4744_v50, %v3117_v40 }
 0x2a1   : > { %v3181_v28 = vmax.f32 %v3165_v45, 0.0 }
 0x2a3   : > { %3842 = vst [vmem:[%s4389_s21 + $0x1f8] sm:$0xff] %v3181_v28 }
 0x2a4   : > { %s3844_s20 = sshll.u32 %s3987_s15, 4  ;;  %s3845_s27 = sshll.u32 %s3991_s16, 7 }
 0x2a5   : > { %s3211_s28 = sadd.s32 %s3845_s27, %s3844_s20  ;;  %s3224_s29 = sshll.u32 %s4389_s21, 4  ;;  %s3225_s29 = int_to_ptr.vmem [resolvable:$true] %s3224_s29 }
 0x2a6   : > { %s3846_s4 = sshll.u32 %s3211_s28, 3  ;;  %s4005_s8 = smov 2048  }
 0x2a7   : > { %s3213_s7 = scalar_lea.hbm %s4952_s3, %s3846_s4  ;;  %3851 = sst [smem:[#allocation6]] (%p4083_p3), %s4005_s8 }
 0x2a8   : > { %s3226_s9 = sshll.u32 %s3213_s7, 4  ;;  %s4006_s10 = smov 4096   ;;  %s3227_s9 = int_to_ptr.hbm [resolvable:$true] %s3226_s9 }
 0x2a9   : > { %3852 = sst [smem:[#allocation6 + $0x1]] (%p4083_p3), %s4006_s10  ;;  %s4007_s15 = smov 16  }
 0x2aa   : > { %3853 = sst [smem:[#allocation6 + $0x2]] (%p4083_p3), %s4007_s15  ;;  %s4008_s16 = smov 128  }
 0x2ab   : > { %3854 = sst [smem:[#allocation6 + $0x3]] (%p4083_p3), %s4008_s16  ;;  %s4009_s21 = smov 8  }
 0x2ac   : > { %3855 = sst [smem:[#allocation6 + $0x4]] (%p4083_p3), %s4008_s16  ;;  %s4010_s11 = smov [#allocation5]  }
 0x2ad   : > { %3856 = sst [smem:[#allocation6 + $0x5]] (%p4083_p3), %s4009_s21  ;;  %s4011_s20 = smov 0  }
 0x2ae   : > { %3857 = dma.general (%p4083_p3), %s3225_s29, 8192, %s3227_s9, %s3200_s24, %s4010_s11, [#allocation6], %s4011_s20, 0  }
 0x2af PF: > { %p3863_p0 = scmp.ge.s32.totalorder %s4003_s19, 2  ;;  %s3254_s27 = sand.u32 1, %s3975_s12  }
 0x2b0   : > { %s3255_s28 = scalar_lea.sflag [#allocation4], %s3254_s27 }
 0x2b1   : > { %p3860_p1 = pnand %p3863_p0, %p4092_p8 }
 0x2b3   : > { %p3861_p2 = pneg %p3860_p1 }
 0x2b5   : > { %3970 = dma.done.wait (%p3861_p2), %s3255_s28, 8192  }
 0x2b6   : > { %3972 = vsyncadd (%p3861_p2), %s3255_s28, 4294959104  ;;  %s16_s19 = sadd.s32 1, %s4003_s19   ;;  %s4955_s12 = smov %s3979_s13 }
 0x2b7   : > { %p13_p4 = scmp.ge.s32.totalorder %s16_s19, 6   ;;  %s4956_s13 = smov %s3983_s14 }
 0x2b8   : > { %s4957_s14 = smov %s4101_s30  ;;  %s4958_s15 = smov %s3995_s17 }
 0x2b9   : > { %s4959_s16 = smov %s3999_s18  ;;  %s4960_s17 = smov %s4963_s22 }
 0x2ba   : > { %s4961_s18 = smov %s4967_s23  ;;  %15 = sbr.rel (!%p13_p4) target bundleno = 5 (0x5), region = 92 }
 0x2bf   :  { %3261 = vsyncpa [#allocation4], 1 }
 0x2c0   :  { %3263 = vsyncpa [#allocation4 + $0x1], 1 }

</bundles_post_ra>
